<compile_context>
chip_gen: v6e
topology: v6e:2x2x1
jax: 0.10.0
libtpu: 0.0.40
codegen_flags: <defaults>
</compile_context>

<pallas_src>
import math
from functools import partial

import numpy as np
import jax
import jax.numpy as jnp
from jax.experimental import pallas as pl
from jax.experimental.pallas import tpu as pltpu

BN_EPS = 1e-5
BN_SCALE = 1.0 / math.sqrt(1.0 + BN_EPS)  # eval-mode BN1d: gamma=1, beta=0, mean=0, var=1


def make_ks_list(ks):
    ks_list = [ks // (2 ** i) for i in range(3)]
    return [k if k % 2 == 1 else k - 1 for k in ks_list]


# ----------------------------------------------------------------------------
# Parameter init (mirrors reset_parameters: kaiming-normal fan_out for Conv1d,
# BN gamma=1 / beta=0).  The BN scale is folded into conv / shortcut weights here.
# ----------------------------------------------------------------------------
def init_params(key, c_in, c_out, n_cate, nf, ks, depth=6):
    ks_list = make_ks_list(ks)
    kmax = max(ks_list)
    half = max((kmax - 1) // 2, 1)
    n_shifts = 2 * half + 1
    keys = iter(jax.random.split(key, 128))

    def kaiming(k, shape, fan_out):
        return jax.random.normal(k, shape, jnp.float32) * math.sqrt(2.0 / fan_out)

    params = {
        "w_cate": kaiming(next(keys), (c_in, n_cate), c_in),
        "w_nume": kaiming(next(keys), (c_in, 10), c_in),
        "w_demo": jax.random.normal(next(keys), (c_in, 4), jnp.float32) / math.sqrt(4.0),
    }
    modules = []
    for d in range(depth):
        ni = c_in if d == 0 else 4 * nf
        w_bott = kaiming(next(keys), (nf, ni), nf)
        # Merged weight for the 3 conv branches: (3*nf, n_shifts*nf).  Column block k
        # corresponds to time shift (k - half); taps a branch does not use stay zero.
        w_all = np.zeros((3 * nf, n_shifts * nf), np.float32)
        for i, K in enumerate(ks_list):
            hk = (K - 1) // 2
            w_i = np.asarray(kaiming(next(keys), (K, nf, nf), nf * K))   # tap-major
            for t in range(K):
                k = (t - hk) + half
                w_all[i * nf:(i + 1) * nf, k * nf:(k + 1) * nf] = w_i[t]
        w_all = jnp.asarray(w_all) * BN_SCALE
        w_mp = kaiming(next(keys), (nf, ni), nf) * BN_SCALE
        modules.append((w_bott, w_all, w_mp))
    params["modules"] = modules
    params["w_sc0"] = kaiming(next(keys), (4 * nf, c_in), 4 * nf) * BN_SCALE  # d=2 shortcut
    params["fc_w"] = jax.random.normal(next(keys), (c_out, 4 * nf), jnp.float32) / math.sqrt(4.0 * nf)
    params["fc_b"] = jnp.zeros((c_out, 1), jnp.float32)
    meta = dict(depth=depth, nf=nf, c_in=c_in, c_out=c_out, half=half, n_shifts=n_shifts)
    return params, meta


# ----------------------------------------------------------------------------
# Per-lane constants (built once at trace time, baked in as small VMEM arrays).
#   masks[k]   : (1, N) "shift by (k - half) stays inside its batch segment" mask.
#   mp_bias[0/1]: (1, N) additive -inf-style boundary bias for the maxpool(3,1,1) branch.
#   E / A      : per-segment broadcast-over-time (B,N) and average-over-time (N,B) matrices.
# ----------------------------------------------------------------------------
def _build_constants(L, B, half):
    N = B * L
    n_shifts = 2 * half + 1
    t = np.arange(N) % L
    masks = np.zeros((n_shifts, 1, N), np.float32)
    for k in range(n_shifts):
        dsh = k - half
        masks[k, 0, :] = ((t + dsh >= 0) & (t + dsh <= L - 1)).astype(np.float32)
    mp_bias = np.zeros((2, 1, N), np.float32)
    mp_bias[0, 0, t == 0] = -1e30        # left neighbor missing
    mp_bias[1, 0, t == L - 1] = -1e30    # right neighbor missing
    seg = (np.arange(N)[None, :] // L) == np.arange(B)[:, None]
    E = seg.astype(np.float32)           # (B, N)
    A = E.T / float(L)                   # (N, B)
    return jnp.asarray(masks), jnp.asarray(mp_bias), jnp.asarray(E), jnp.asarray(A)


# ----------------------------------------------------------------------------
# Fully fused forward: one pallas_call for encoder + InceptionTimePlus backbone + head.
# ----------------------------------------------------------------------------
def inception_time_forward(params, meta, cate, nume, demo):
    B, n_cate, L = cate.shape
    depth, nf = meta["depth"], meta["nf"]
    c_in, c_out = meta["c_in"], meta["c_out"]
    half, n_shifts = meta["half"], meta["n_shifts"]
    N = B * L
    mods = params["modules"]
    assert len(mods) == depth

    # Layout plumbing only: channels -> sublanes, batch*time -> lanes (lane-dense).
    cate2 = jnp.transpose(cate, (1, 0, 2)).reshape(n_cate, N)
    nume2 = jnp.transpose(nume, (1, 0, 2)).reshape(10, N)
    demo_t = jnp.transpose(demo)                                    # (4, B)

    masks_c, mp_bias_c, E_c, A_c = _build_constants(L, B, half)

    def kernel(*refs):
        it = iter(refs)
        cate_ref, nume_ref, demo_ref = next(it), next(it), next(it)
        wc_ref, wn_ref, wd_ref = next(it), next(it), next(it)
        e_ref, a_ref, mask_ref, mpb_ref = next(it), next(it), next(it), next(it)
        mod_refs = [(next(it), next(it), next(it)) for _ in range(depth)]
        wsc_ref, wfc_ref, bfc_ref = next(it), next(it), next(it)
        out_ref = next(it)

        dot = partial(jnp.dot, preferred_element_type=jnp.float32)

        # Hoisted per-lane constants (loaded once, reused by all 6 modules).
        masks = [mask_ref[k] for k in range(n_shifts)]              # each (1, N)
        bias_l = mpb_ref[0]                                         # (1, N)
        bias_r = mpb_ref[1]

        def shift(v, dsh):
            # v[:, n] -> v[:, n + dsh] within each batch segment, zero-padded ('same' conv).
            # Realized as an XLU lane rotation + per-lane mask (no MXU / unaligned slices).
            if dsh == 0:
                return v
            return pltpu.roll(v, (-dsh) % N, axis=1) * masks[dsh + half]

        # ---- encoder: h = Wc@cate + Wn@nume + (Wd@demo) broadcast over time ----
        h = dot(wc_ref[...], cate_ref[...]) + dot(wn_ref[...], nume_ref[...])
        h = h + dot(dot(wd_ref[...], demo_ref[...]), e_ref[...])    # (c_in, N)
        x = h
        res = h

        for m in range(depth):
            wb_ref, wall_ref, wmp_ref = mod_refs[m]
            # bottleneck (bias-free 1x1 conv)
            bt = dot(wb_ref[...], x)                                # (nf, N)
            # im2col stack of time-shifted copies -> ONE matmul for all 3 conv branches
            s = jnp.concatenate([shift(bt, k - half) for k in range(n_shifts)], axis=0)
            y_conv = dot(wall_ref[...], s)                          # (3*nf, N), BN folded
            # maxpool(3, stride 1, pad 1) branch (boundaries padded with -1e30 ~ -inf)
            x_l = pltpu.roll(x, 1, axis=1) + bias_l                 # neighbor t-1
            x_r = pltpu.roll(x, N - 1, axis=1) + bias_r             # neighbor t+1
            mp = jnp.maximum(jnp.maximum(x_l, x), x_r)
            y_mp = dot(wmp_ref[...], mp)                            # (nf, N), BN folded
            x = jax.nn.relu(jnp.concatenate([y_conv, y_mp], axis=0))  # (4*nf, N)
            # residual every 3 modules: conv+BN shortcut at m=2, BN-only at m=5
            if m % 3 == 2:
                sc = dot(wsc_ref[...], res) if m // 3 == 0 else res * jnp.float32(BN_SCALE)
                x = jax.nn.relu(x + sc)
                res = x

        # ---- head: global average pool over time (per segment) + Linear ----
        g = dot(x, a_ref[...])                                      # (4*nf, B)
        out_ref[...] = dot(wfc_ref[...], g) + bfc_ref[...]          # (c_out, B)

    def full_spec(shape):
        n = len(shape)
        return pl.BlockSpec(shape, lambda i, _n=n: (0,) * _n)

    inputs = [cate2, nume2, demo_t,
              params["w_cate"], params["w_nume"], params["w_demo"],
              E_c, A_c, masks_c, mp_bias_c]
    for (wb, wall, wmp) in mods:
        inputs += [wb, wall, wmp]
    inputs += [params["w_sc0"], params["fc_w"], params["fc_b"]]

    out = pl.pallas_call(
        kernel,
        out_shape=jax.ShapeDtypeStruct((c_out, B), jnp.float32),
        grid=(1,),
        in_specs=[full_spec(tuple(a.shape)) for a in inputs],
        out_specs=full_spec((c_out, B)),
        compiler_params=pltpu.CompilerParams(dimension_semantics=("arbitrary",)),
    )(*inputs)
    return jnp.transpose(out)                                       # (B, c_out)


if __name__ == "__main__":
    # Small shapes, chosen so that N = B*L = 128 (one full lane tile) and the channel
    # counts (c_in=8, 4*nf=32) are sublane-aligned.
    B, c_in, c_out, L = 2, 8, 4, 64
    nf = 8
    ks = 9
    n_cate = 6

    key = jax.random.PRNGKey(0)
    k1, k2, k3, kp = jax.random.split(key, 4)
    cate = jax.random.normal(k1, (B, n_cate, L), jnp.float32)
    nume = jax.random.normal(k2, (B, 10, L), jnp.float32)
    demo = jax.random.normal(k3, (B, 4), jnp.float32)

    params, meta = init_params(kp, c_in, c_out, n_cate, nf, ks)

    @jax.jit
    def fwd(params, cate, nume, demo):
        return inception_time_forward(params, meta, cate, nume, demo)

    out = fwd(params, cate, nume, demo)
    jax.block_until_ready(out)
    assert out.shape == (B, c_out), out.shape
    assert bool(jnp.all(jnp.isfinite(out)))
    print("KERNEL_OK")
</pallas_src>

<mosaic_0001>
module attributes {stable_mosaic.version = 11 : i64} {
  func.func @kernel(%arg0: i32, %arg1: memref<6x128xf32, #tpu.memory_space<vmem>>, %arg2: memref<10x128xf32, #tpu.memory_space<vmem>>, %arg3: memref<4x2xf32, #tpu.memory_space<vmem>>, %arg4: memref<8x6xf32, #tpu.memory_space<vmem>>, %arg5: memref<8x10xf32, #tpu.memory_space<vmem>>, %arg6: memref<8x4xf32, #tpu.memory_space<vmem>>, %arg7: memref<2x128xf32, #tpu.memory_space<vmem>>, %arg8: memref<128x2xf32, #tpu.memory_space<vmem>>, %arg9: memref<9x1x128xf32, #tpu.memory_space<vmem>>, %arg10: memref<2x1x128xf32, #tpu.memory_space<vmem>>, %arg11: memref<8x8xf32, #tpu.memory_space<vmem>>, %arg12: memref<24x72xf32, #tpu.memory_space<vmem>>, %arg13: memref<8x8xf32, #tpu.memory_space<vmem>>, %arg14: memref<8x32xf32, #tpu.memory_space<vmem>>, %arg15: memref<24x72xf32, #tpu.memory_space<vmem>>, %arg16: memref<8x32xf32, #tpu.memory_space<vmem>>, %arg17: memref<8x32xf32, #tpu.memory_space<vmem>>, %arg18: memref<24x72xf32, #tpu.memory_space<vmem>>, %arg19: memref<8x32xf32, #tpu.memory_space<vmem>>, %arg20: memref<8x32xf32, #tpu.memory_space<vmem>>, %arg21: memref<24x72xf32, #tpu.memory_space<vmem>>, %arg22: memref<8x32xf32, #tpu.memory_space<vmem>>, %arg23: memref<8x32xf32, #tpu.memory_space<vmem>>, %arg24: memref<24x72xf32, #tpu.memory_space<vmem>>, %arg25: memref<8x32xf32, #tpu.memory_space<vmem>>, %arg26: memref<8x32xf32, #tpu.memory_space<vmem>>, %arg27: memref<24x72xf32, #tpu.memory_space<vmem>>, %arg28: memref<8x32xf32, #tpu.memory_space<vmem>>, %arg29: memref<32x8xf32, #tpu.memory_space<vmem>>, %arg30: memref<4x32xf32, #tpu.memory_space<vmem>>, %arg31: memref<4x1xf32, #tpu.memory_space<vmem>>, %arg32: memref<4x2xf32, #tpu.memory_space<vmem>>) attributes {dimension_semantics = [#tpu.dimension_semantics<arbitrary>], iteration_bounds = array<i64: 1>, scalar_prefetch = 0 : i64, scratch_operands = 0 : i64, tpu.core_type = #tpu.core_type<tc>, window_params = [{pipeline_mode = #tpu.pipeline_mode<synchronous>, transform_indices = @transform_0, window_bounds = array<i64: 6, 128>}, {pipeline_mode = #tpu.pipeline_mode<synchronous>, transform_indices = @transform_1, window_bounds = array<i64: 10, 128>}, {pipeline_mode = #tpu.pipeline_mode<synchronous>, transform_indices = @transform_2, window_bounds = array<i64: 4, 2>}, {pipeline_mode = #tpu.pipeline_mode<synchronous>, transform_indices = @transform_3, window_bounds = array<i64: 8, 6>}, {pipeline_mode = #tpu.pipeline_mode<synchronous>, transform_indices = @transform_4, window_bounds = array<i64: 8, 10>}, {pipeline_mode = #tpu.pipeline_mode<synchronous>, transform_indices = @transform_5, window_bounds = array<i64: 8, 4>}, {pipeline_mode = #tpu.pipeline_mode<synchronous>, transform_indices = @transform_6, window_bounds = array<i64: 2, 128>}, {pipeline_mode = #tpu.pipeline_mode<synchronous>, transform_indices = @transform_7, window_bounds = array<i64: 128, 2>}, {pipeline_mode = #tpu.pipeline_mode<synchronous>, transform_indices = @transform_8, window_bounds = array<i64: 9, 1, 128>}, {pipeline_mode = #tpu.pipeline_mode<synchronous>, transform_indices = @transform_9, window_bounds = array<i64: 2, 1, 128>}, {pipeline_mode = #tpu.pipeline_mode<synchronous>, transform_indices = @transform_10, window_bounds = array<i64: 8, 8>}, {pipeline_mode = #tpu.pipeline_mode<synchronous>, transform_indices = @transform_11, window_bounds = array<i64: 24, 72>}, {pipeline_mode = #tpu.pipeline_mode<synchronous>, transform_indices = @transform_12, window_bounds = array<i64: 8, 8>}, {pipeline_mode = #tpu.pipeline_mode<synchronous>, transform_indices = @transform_13, window_bounds = array<i64: 8, 32>}, {pipeline_mode = #tpu.pipeline_mode<synchronous>, transform_indices = @transform_14, window_bounds = array<i64: 24, 72>}, {pipeline_mode = #tpu.pipeline_mode<synchronous>, transform_indices = @transform_15, window_bounds = array<i64: 8, 32>}, {pipeline_mode = #tpu.pipeline_mode<synchronous>, transform_indices = @transform_16, window_bounds = array<i64: 8, 32>}, {pipeline_mode = #tpu.pipeline_mode<synchronous>, transform_indices = @transform_17, window_bounds = array<i64: 24, 72>}, {pipeline_mode = #tpu.pipeline_mode<synchronous>, transform_indices = @transform_18, window_bounds = array<i64: 8, 32>}, {pipeline_mode = #tpu.pipeline_mode<synchronous>, transform_indices = @transform_19, window_bounds = array<i64: 8, 32>}, {pipeline_mode = #tpu.pipeline_mode<synchronous>, transform_indices = @transform_20, window_bounds = array<i64: 24, 72>}, {pipeline_mode = #tpu.pipeline_mode<synchronous>, transform_indices = @transform_21, window_bounds = array<i64: 8, 32>}, {pipeline_mode = #tpu.pipeline_mode<synchronous>, transform_indices = @transform_22, window_bounds = array<i64: 8, 32>}, {pipeline_mode = #tpu.pipeline_mode<synchronous>, transform_indices = @transform_23, window_bounds = array<i64: 24, 72>}, {pipeline_mode = #tpu.pipeline_mode<synchronous>, transform_indices = @transform_24, window_bounds = array<i64: 8, 32>}, {pipeline_mode = #tpu.pipeline_mode<synchronous>, transform_indices = @transform_25, window_bounds = array<i64: 8, 32>}, {pipeline_mode = #tpu.pipeline_mode<synchronous>, transform_indices = @transform_26, window_bounds = array<i64: 24, 72>}, {pipeline_mode = #tpu.pipeline_mode<synchronous>, transform_indices = @transform_27, window_bounds = array<i64: 8, 32>}, {pipeline_mode = #tpu.pipeline_mode<synchronous>, transform_indices = @transform_28, window_bounds = array<i64: 32, 8>}, {pipeline_mode = #tpu.pipeline_mode<synchronous>, transform_indices = @transform_29, window_bounds = array<i64: 4, 32>}, {pipeline_mode = #tpu.pipeline_mode<synchronous>, transform_indices = @transform_30, window_bounds = array<i64: 4, 1>}, {pipeline_mode = #tpu.pipeline_mode<synchronous>, transform_indices = @transform_31, window_bounds = array<i64: 4, 2>}]} {
    %c0 = arith.constant 0 : index
    %c0_0 = arith.constant 0 : index
    %c0_1 = arith.constant 0 : index
    %0 = vector.load %arg9[%c0, %c0_0, %c0_1] : memref<9x1x128xf32, #tpu.memory_space<vmem>>, vector<1x1x128xf32>
    %1 = vector.shape_cast %0 : vector<1x1x128xf32> to vector<1x128xf32>
    %c1 = arith.constant 1 : index
    %c0_2 = arith.constant 0 : index
    %c0_3 = arith.constant 0 : index
    %2 = vector.load %arg9[%c1, %c0_2, %c0_3] : memref<9x1x128xf32, #tpu.memory_space<vmem>>, vector<1x1x128xf32>
    %3 = vector.shape_cast %2 : vector<1x1x128xf32> to vector<1x128xf32>
    %c2 = arith.constant 2 : index
    %c0_4 = arith.constant 0 : index
    %c0_5 = arith.constant 0 : index
    %4 = vector.load %arg9[%c2, %c0_4, %c0_5] : memref<9x1x128xf32, #tpu.memory_space<vmem>>, vector<1x1x128xf32>
    %5 = vector.shape_cast %4 : vector<1x1x128xf32> to vector<1x128xf32>
    %c3 = arith.constant 3 : index
    %c0_6 = arith.constant 0 : index
    %c0_7 = arith.constant 0 : index
    %6 = vector.load %arg9[%c3, %c0_6, %c0_7] : memref<9x1x128xf32, #tpu.memory_space<vmem>>, vector<1x1x128xf32>
    %7 = vector.shape_cast %6 : vector<1x1x128xf32> to vector<1x128xf32>
    %c5 = arith.constant 5 : index
    %c0_8 = arith.constant 0 : index
    %c0_9 = arith.constant 0 : index
    %8 = vector.load %arg9[%c5, %c0_8, %c0_9] : memref<9x1x128xf32, #tpu.memory_space<vmem>>, vector<1x1x128xf32>
    %9 = vector.shape_cast %8 : vector<1x1x128xf32> to vector<1x128xf32>
    %c6 = arith.constant 6 : index
    %c0_10 = arith.constant 0 : index
    %c0_11 = arith.constant 0 : index
    %10 = vector.load %arg9[%c6, %c0_10, %c0_11] : memref<9x1x128xf32, #tpu.memory_space<vmem>>, vector<1x1x128xf32>
    %11 = vector.shape_cast %10 : vector<1x1x128xf32> to vector<1x128xf32>
    %c7 = arith.constant 7 : index
    %c0_12 = arith.constant 0 : index
    %c0_13 = arith.constant 0 : index
    %12 = vector.load %arg9[%c7, %c0_12, %c0_13] : memref<9x1x128xf32, #tpu.memory_space<vmem>>, vector<1x1x128xf32>
    %13 = vector.shape_cast %12 : vector<1x1x128xf32> to vector<1x128xf32>
    %c8 = arith.constant 8 : index
    %c0_14 = arith.constant 0 : index
    %c0_15 = arith.constant 0 : index
    %14 = vector.load %arg9[%c8, %c0_14, %c0_15] : memref<9x1x128xf32, #tpu.memory_space<vmem>>, vector<1x1x128xf32>
    %15 = vector.shape_cast %14 : vector<1x1x128xf32> to vector<1x128xf32>
    %c0_16 = arith.constant 0 : index
    %c0_17 = arith.constant 0 : index
    %c0_18 = arith.constant 0 : index
    %16 = vector.load %arg10[%c0_16, %c0_17, %c0_18] : memref<2x1x128xf32, #tpu.memory_space<vmem>>, vector<1x1x128xf32>
    %17 = vector.shape_cast %16 : vector<1x1x128xf32> to vector<1x128xf32>
    %c1_19 = arith.constant 1 : index
    %c0_20 = arith.constant 0 : index
    %c0_21 = arith.constant 0 : index
    %18 = vector.load %arg10[%c1_19, %c0_20, %c0_21] : memref<2x1x128xf32, #tpu.memory_space<vmem>>, vector<1x1x128xf32>
    %19 = vector.shape_cast %18 : vector<1x1x128xf32> to vector<1x128xf32>
    %c0_22 = arith.constant 0 : index
    %c0_23 = arith.constant 0 : index
    %20 = vector.load %arg4[%c0_22, %c0_23] : memref<8x6xf32, #tpu.memory_space<vmem>>, vector<8x6xf32>
    %c0_24 = arith.constant 0 : index
    %c0_25 = arith.constant 0 : index
    %21 = vector.load %arg1[%c0_24, %c0_25] : memref<6x128xf32, #tpu.memory_space<vmem>>, vector<6x128xf32>
    %cst = arith.constant dense<0.000000e+00> : vector<8x128xf32>
    %22 = tpu.matmul %20, %21, %cst {dimension_numbers = #tpu.dot_dimension_numbers<[1], [0], [0], [1], [0, 0, 1, 1], [], []>} : vector<8x6xf32>, vector<6x128xf32>, vector<8x128xf32> -> vector<8x128xf32>
    %c0_26 = arith.constant 0 : index
    %c0_27 = arith.constant 0 : index
    %23 = vector.load %arg5[%c0_26, %c0_27] : memref<8x10xf32, #tpu.memory_space<vmem>>, vector<8x10xf32>
    %c0_28 = arith.constant 0 : index
    %c0_29 = arith.constant 0 : index
    %24 = vector.load %arg2[%c0_28, %c0_29] : memref<10x128xf32, #tpu.memory_space<vmem>>, vector<10x128xf32>
    %cst_30 = arith.constant dense<0.000000e+00> : vector<8x128xf32>
    %25 = tpu.matmul %23, %24, %cst_30 {dimension_numbers = #tpu.dot_dimension_numbers<[1], [0], [0], [1], [0, 0, 1, 1], [], []>} : vector<8x10xf32>, vector<10x128xf32>, vector<8x128xf32> -> vector<8x128xf32>
    %26 = arith.addf %22, %25 : vector<8x128xf32>
    %c0_31 = arith.constant 0 : index
    %c0_32 = arith.constant 0 : index
    %27 = vector.load %arg6[%c0_31, %c0_32] : memref<8x4xf32, #tpu.memory_space<vmem>>, vector<8x4xf32>
    %c0_33 = arith.constant 0 : index
    %c0_34 = arith.constant 0 : index
    %28 = vector.load %arg3[%c0_33, %c0_34] : memref<4x2xf32, #tpu.memory_space<vmem>>, vector<4x2xf32>
    %cst_35 = arith.constant dense<0.000000e+00> : vector<8x2xf32>
    %29 = tpu.matmul %27, %28, %cst_35 {dimension_numbers = #tpu.dot_dimension_numbers<[1], [0], [0], [1], [0, 0, 1, 1], [], []>} : vector<8x4xf32>, vector<4x2xf32>, vector<8x2xf32> -> vector<8x2xf32>
    %c0_36 = arith.constant 0 : index
    %c0_37 = arith.constant 0 : index
    %30 = vector.load %arg7[%c0_36, %c0_37] : memref<2x128xf32, #tpu.memory_space<vmem>>, vector<2x128xf32>
    %cst_38 = arith.constant dense<0.000000e+00> : vector<8x128xf32>
    %31 = tpu.matmul %29, %30, %cst_38 {dimension_numbers = #tpu.dot_dimension_numbers<[1], [0], [0], [1], [0, 0, 1, 1], [], []>} : vector<8x2xf32>, vector<2x128xf32>, vector<8x128xf32> -> vector<8x128xf32>
    %32 = arith.addf %26, %31 : vector<8x128xf32>
    %c0_39 = arith.constant 0 : index
    %c0_40 = arith.constant 0 : index
    %33 = vector.load %arg11[%c0_39, %c0_40] : memref<8x8xf32, #tpu.memory_space<vmem>>, vector<8x8xf32>
    %cst_41 = arith.constant dense<0.000000e+00> : vector<8x128xf32>
    %34 = tpu.matmul %33, %32, %cst_41 {dimension_numbers = #tpu.dot_dimension_numbers<[1], [0], [0], [1], [0, 0, 1, 1], [], []>} : vector<8x8xf32>, vector<8x128xf32>, vector<8x128xf32> -> vector<8x128xf32>
    %c4_i32 = arith.constant 4 : i32
    %35 = tpu.dynamic_rotate %34 by %c4_i32 dim 1 : vector<8x128xf32>, i32 -> vector<8x128xf32>
    %36 = vector.broadcast %1 : vector<1x128xf32> to vector<8x128xf32>
    %37 = arith.mulf %35, %36 : vector<8x128xf32>
    %c3_i32 = arith.constant 3 : i32
    %38 = tpu.dynamic_rotate %34 by %c3_i32 dim 1 : vector<8x128xf32>, i32 -> vector<8x128xf32>
    %39 = vector.broadcast %3 : vector<1x128xf32> to vector<8x128xf32>
    %40 = arith.mulf %38, %39 : vector<8x128xf32>
    %c2_i32 = arith.constant 2 : i32
    %41 = tpu.dynamic_rotate %34 by %c2_i32 dim 1 : vector<8x128xf32>, i32 -> vector<8x128xf32>
    %42 = vector.broadcast %5 : vector<1x128xf32> to vector<8x128xf32>
    %43 = arith.mulf %41, %42 : vector<8x128xf32>
    %c1_i32 = arith.constant 1 : i32
    %44 = tpu.dynamic_rotate %34 by %c1_i32 dim 1 : vector<8x128xf32>, i32 -> vector<8x128xf32>
    %45 = vector.broadcast %7 : vector<1x128xf32> to vector<8x128xf32>
    %46 = arith.mulf %44, %45 : vector<8x128xf32>
    %c127_i32 = arith.constant 127 : i32
    %47 = tpu.dynamic_rotate %34 by %c127_i32 dim 1 : vector<8x128xf32>, i32 -> vector<8x128xf32>
    %48 = vector.broadcast %9 : vector<1x128xf32> to vector<8x128xf32>
    %49 = arith.mulf %47, %48 : vector<8x128xf32>
    %c126_i32 = arith.constant 126 : i32
    %50 = tpu.dynamic_rotate %34 by %c126_i32 dim 1 : vector<8x128xf32>, i32 -> vector<8x128xf32>
    %51 = vector.broadcast %11 : vector<1x128xf32> to vector<8x128xf32>
    %52 = arith.mulf %50, %51 : vector<8x128xf32>
    %c125_i32 = arith.constant 125 : i32
    %53 = tpu.dynamic_rotate %34 by %c125_i32 dim 1 : vector<8x128xf32>, i32 -> vector<8x128xf32>
    %54 = vector.broadcast %13 : vector<1x128xf32> to vector<8x128xf32>
    %55 = arith.mulf %53, %54 : vector<8x128xf32>
    %c124_i32 = arith.constant 124 : i32
    %56 = tpu.dynamic_rotate %34 by %c124_i32 dim 1 : vector<8x128xf32>, i32 -> vector<8x128xf32>
    %57 = vector.broadcast %15 : vector<1x128xf32> to vector<8x128xf32>
    %58 = arith.mulf %56, %57 : vector<8x128xf32>
    %59 = tpu.concatenate %37, %40, %43, %46, %34, %49, %52, %55, %58 in 0 : vector<8x128xf32>, vector<8x128xf32>, vector<8x128xf32>, vector<8x128xf32>, vector<8x128xf32>, vector<8x128xf32>, vector<8x128xf32>, vector<8x128xf32>, vector<8x128xf32> -> vector<72x128xf32>
    %c0_42 = arith.constant 0 : index
    %c0_43 = arith.constant 0 : index
    %60 = vector.load %arg12[%c0_42, %c0_43] : memref<24x72xf32, #tpu.memory_space<vmem>>, vector<24x72xf32>
    %cst_44 = arith.constant dense<0.000000e+00> : vector<24x128xf32>
    %61 = tpu.matmul %60, %59, %cst_44 {dimension_numbers = #tpu.dot_dimension_numbers<[1], [0], [0], [1], [0, 0, 1, 1], [], []>} : vector<24x72xf32>, vector<72x128xf32>, vector<24x128xf32> -> vector<24x128xf32>
    %c1_i32_45 = arith.constant 1 : i32
    %62 = tpu.dynamic_rotate %32 by %c1_i32_45 dim 1 : vector<8x128xf32>, i32 -> vector<8x128xf32>
    %63 = vector.broadcast %17 : vector<1x128xf32> to vector<8x128xf32>
    %64 = arith.addf %62, %63 : vector<8x128xf32>
    %c127_i32_46 = arith.constant 127 : i32
    %65 = tpu.dynamic_rotate %32 by %c127_i32_46 dim 1 : vector<8x128xf32>, i32 -> vector<8x128xf32>
    %66 = vector.broadcast %19 : vector<1x128xf32> to vector<8x128xf32>
    %67 = arith.addf %65, %66 : vector<8x128xf32>
    %68 = arith.maximumf %64, %32 : vector<8x128xf32>
    %69 = arith.maximumf %68, %67 : vector<8x128xf32>
    %c0_47 = arith.constant 0 : index
    %c0_48 = arith.constant 0 : index
    %70 = vector.load %arg13[%c0_47, %c0_48] : memref<8x8xf32, #tpu.memory_space<vmem>>, vector<8x8xf32>
    %cst_49 = arith.constant dense<0.000000e+00> : vector<8x128xf32>
    %71 = tpu.matmul %70, %69, %cst_49 {dimension_numbers = #tpu.dot_dimension_numbers<[1], [0], [0], [1], [0, 0, 1, 1], [], []>} : vector<8x8xf32>, vector<8x128xf32>, vector<8x128xf32> -> vector<8x128xf32>
    %72 = tpu.concatenate %61, %71 in 0 : vector<24x128xf32>, vector<8x128xf32> -> vector<32x128xf32>
    %cst_50 = arith.constant 0.000000e+00 : f32
    %73 = vector.broadcast %cst_50 : f32 to vector<32x128xf32>
    %74 = arith.maximumf %72, %73 : vector<32x128xf32>
    %c0_51 = arith.constant 0 : index
    %c0_52 = arith.constant 0 : index
    %75 = vector.load %arg14[%c0_51, %c0_52] : memref<8x32xf32, #tpu.memory_space<vmem>>, vector<8x32xf32>
    %cst_53 = arith.constant dense<0.000000e+00> : vector<8x128xf32>
    %76 = tpu.matmul %75, %74, %cst_53 {dimension_numbers = #tpu.dot_dimension_numbers<[1], [0], [0], [1], [0, 0, 1, 1], [], []>} : vector<8x32xf32>, vector<32x128xf32>, vector<8x128xf32> -> vector<8x128xf32>
    %c4_i32_54 = arith.constant 4 : i32
    %77 = tpu.dynamic_rotate %76 by %c4_i32_54 dim 1 : vector<8x128xf32>, i32 -> vector<8x128xf32>
    %78 = vector.broadcast %1 : vector<1x128xf32> to vector<8x128xf32>
    %79 = arith.mulf %77, %78 : vector<8x128xf32>
    %c3_i32_55 = arith.constant 3 : i32
    %80 = tpu.dynamic_rotate %76 by %c3_i32_55 dim 1 : vector<8x128xf32>, i32 -> vector<8x128xf32>
    %81 = vector.broadcast %3 : vector<1x128xf32> to vector<8x128xf32>
    %82 = arith.mulf %80, %81 : vector<8x128xf32>
    %c2_i32_56 = arith.constant 2 : i32
    %83 = tpu.dynamic_rotate %76 by %c2_i32_56 dim 1 : vector<8x128xf32>, i32 -> vector<8x128xf32>
    %84 = vector.broadcast %5 : vector<1x128xf32> to vector<8x128xf32>
    %85 = arith.mulf %83, %84 : vector<8x128xf32>
    %c1_i32_57 = arith.constant 1 : i32
    %86 = tpu.dynamic_rotate %76 by %c1_i32_57 dim 1 : vector<8x128xf32>, i32 -> vector<8x128xf32>
    %87 = vector.broadcast %7 : vector<1x128xf32> to vector<8x128xf32>
    %88 = arith.mulf %86, %87 : vector<8x128xf32>
    %c127_i32_58 = arith.constant 127 : i32
    %89 = tpu.dynamic_rotate %76 by %c127_i32_58 dim 1 : vector<8x128xf32>, i32 -> vector<8x128xf32>
    %90 = vector.broadcast %9 : vector<1x128xf32> to vector<8x128xf32>
    %91 = arith.mulf %89, %90 : vector<8x128xf32>
    %c126_i32_59 = arith.constant 126 : i32
    %92 = tpu.dynamic_rotate %76 by %c126_i32_59 dim 1 : vector<8x128xf32>, i32 -> vector<8x128xf32>
    %93 = vector.broadcast %11 : vector<1x128xf32> to vector<8x128xf32>
    %94 = arith.mulf %92, %93 : vector<8x128xf32>
    %c125_i32_60 = arith.constant 125 : i32
    %95 = tpu.dynamic_rotate %76 by %c125_i32_60 dim 1 : vector<8x128xf32>, i32 -> vector<8x128xf32>
    %96 = vector.broadcast %13 : vector<1x128xf32> to vector<8x128xf32>
    %97 = arith.mulf %95, %96 : vector<8x128xf32>
    %c124_i32_61 = arith.constant 124 : i32
    %98 = tpu.dynamic_rotate %76 by %c124_i32_61 dim 1 : vector<8x128xf32>, i32 -> vector<8x128xf32>
    %99 = vector.broadcast %15 : vector<1x128xf32> to vector<8x128xf32>
    %100 = arith.mulf %98, %99 : vector<8x128xf32>
    %101 = tpu.concatenate %79, %82, %85, %88, %76, %91, %94, %97, %100 in 0 : vector<8x128xf32>, vector<8x128xf32>, vector<8x128xf32>, vector<8x128xf32>, vector<8x128xf32>, vector<8x128xf32>, vector<8x128xf32>, vector<8x128xf32>, vector<8x128xf32> -> vector<72x128xf32>
    %c0_62 = arith.constant 0 : index
    %c0_63 = arith.constant 0 : index
    %102 = vector.load %arg15[%c0_62, %c0_63] : memref<24x72xf32, #tpu.memory_space<vmem>>, vector<24x72xf32>
    %cst_64 = arith.constant dense<0.000000e+00> : vector<24x128xf32>
    %103 = tpu.matmul %102, %101, %cst_64 {dimension_numbers = #tpu.dot_dimension_numbers<[1], [0], [0], [1], [0, 0, 1, 1], [], []>} : vector<24x72xf32>, vector<72x128xf32>, vector<24x128xf32> -> vector<24x128xf32>
    %c1_i32_65 = arith.constant 1 : i32
    %104 = tpu.dynamic_rotate %74 by %c1_i32_65 dim 1 : vector<32x128xf32>, i32 -> vector<32x128xf32>
    %105 = vector.broadcast %17 : vector<1x128xf32> to vector<32x128xf32>
    %106 = arith.addf %104, %105 : vector<32x128xf32>
    %c127_i32_66 = arith.constant 127 : i32
    %107 = tpu.dynamic_rotate %74 by %c127_i32_66 dim 1 : vector<32x128xf32>, i32 -> vector<32x128xf32>
    %108 = vector.broadcast %19 : vector<1x128xf32> to vector<32x128xf32>
    %109 = arith.addf %107, %108 : vector<32x128xf32>
    %110 = arith.maximumf %106, %74 : vector<32x128xf32>
    %111 = arith.maximumf %110, %109 : vector<32x128xf32>
    %c0_67 = arith.constant 0 : index
    %c0_68 = arith.constant 0 : index
    %112 = vector.load %arg16[%c0_67, %c0_68] : memref<8x32xf32, #tpu.memory_space<vmem>>, vector<8x32xf32>
    %cst_69 = arith.constant dense<0.000000e+00> : vector<8x128xf32>
    %113 = tpu.matmul %112, %111, %cst_69 {dimension_numbers = #tpu.dot_dimension_numbers<[1], [0], [0], [1], [0, 0, 1, 1], [], []>} : vector<8x32xf32>, vector<32x128xf32>, vector<8x128xf32> -> vector<8x128xf32>
    %114 = tpu.concatenate %103, %113 in 0 : vector<24x128xf32>, vector<8x128xf32> -> vector<32x128xf32>
    %cst_70 = arith.constant 0.000000e+00 : f32
    %115 = vector.broadcast %cst_70 : f32 to vector<32x128xf32>
    %116 = arith.maximumf %114, %115 : vector<32x128xf32>
    %c0_71 = arith.constant 0 : index
    %c0_72 = arith.constant 0 : index
    %117 = vector.load %arg17[%c0_71, %c0_72] : memref<8x32xf32, #tpu.memory_space<vmem>>, vector<8x32xf32>
    %cst_73 = arith.constant dense<0.000000e+00> : vector<8x128xf32>
    %118 = tpu.matmul %117, %116, %cst_73 {dimension_numbers = #tpu.dot_dimension_numbers<[1], [0], [0], [1], [0, 0, 1, 1], [], []>} : vector<8x32xf32>, vector<32x128xf32>, vector<8x128xf32> -> vector<8x128xf32>
    %c4_i32_74 = arith.constant 4 : i32
    %119 = tpu.dynamic_rotate %118 by %c4_i32_74 dim 1 : vector<8x128xf32>, i32 -> vector<8x128xf32>
    %120 = vector.broadcast %1 : vector<1x128xf32> to vector<8x128xf32>
    %121 = arith.mulf %119, %120 : vector<8x128xf32>
    %c3_i32_75 = arith.constant 3 : i32
    %122 = tpu.dynamic_rotate %118 by %c3_i32_75 dim 1 : vector<8x128xf32>, i32 -> vector<8x128xf32>
    %123 = vector.broadcast %3 : vector<1x128xf32> to vector<8x128xf32>
    %124 = arith.mulf %122, %123 : vector<8x128xf32>
    %c2_i32_76 = arith.constant 2 : i32
    %125 = tpu.dynamic_rotate %118 by %c2_i32_76 dim 1 : vector<8x128xf32>, i32 -> vector<8x128xf32>
    %126 = vector.broadcast %5 : vector<1x128xf32> to vector<8x128xf32>
    %127 = arith.mulf %125, %126 : vector<8x128xf32>
    %c1_i32_77 = arith.constant 1 : i32
    %128 = tpu.dynamic_rotate %118 by %c1_i32_77 dim 1 : vector<8x128xf32>, i32 -> vector<8x128xf32>
    %129 = vector.broadcast %7 : vector<1x128xf32> to vector<8x128xf32>
    %130 = arith.mulf %128, %129 : vector<8x128xf32>
    %c127_i32_78 = arith.constant 127 : i32
    %131 = tpu.dynamic_rotate %118 by %c127_i32_78 dim 1 : vector<8x128xf32>, i32 -> vector<8x128xf32>
    %132 = vector.broadcast %9 : vector<1x128xf32> to vector<8x128xf32>
    %133 = arith.mulf %131, %132 : vector<8x128xf32>
    %c126_i32_79 = arith.constant 126 : i32
    %134 = tpu.dynamic_rotate %118 by %c126_i32_79 dim 1 : vector<8x128xf32>, i32 -> vector<8x128xf32>
    %135 = vector.broadcast %11 : vector<1x128xf32> to vector<8x128xf32>
    %136 = arith.mulf %134, %135 : vector<8x128xf32>
    %c125_i32_80 = arith.constant 125 : i32
    %137 = tpu.dynamic_rotate %118 by %c125_i32_80 dim 1 : vector<8x128xf32>, i32 -> vector<8x128xf32>
    %138 = vector.broadcast %13 : vector<1x128xf32> to vector<8x128xf32>
    %139 = arith.mulf %137, %138 : vector<8x128xf32>
    %c124_i32_81 = arith.constant 124 : i32
    %140 = tpu.dynamic_rotate %118 by %c124_i32_81 dim 1 : vector<8x128xf32>, i32 -> vector<8x128xf32>
    %141 = vector.broadcast %15 : vector<1x128xf32> to vector<8x128xf32>
    %142 = arith.mulf %140, %141 : vector<8x128xf32>
    %143 = tpu.concatenate %121, %124, %127, %130, %118, %133, %136, %139, %142 in 0 : vector<8x128xf32>, vector<8x128xf32>, vector<8x128xf32>, vector<8x128xf32>, vector<8x128xf32>, vector<8x128xf32>, vector<8x128xf32>, vector<8x128xf32>, vector<8x128xf32> -> vector<72x128xf32>
    %c0_82 = arith.constant 0 : index
    %c0_83 = arith.constant 0 : index
    %144 = vector.load %arg18[%c0_82, %c0_83] : memref<24x72xf32, #tpu.memory_space<vmem>>, vector<24x72xf32>
    %cst_84 = arith.constant dense<0.000000e+00> : vector<24x128xf32>
    %145 = tpu.matmul %144, %143, %cst_84 {dimension_numbers = #tpu.dot_dimension_numbers<[1], [0], [0], [1], [0, 0, 1, 1], [], []>} : vector<24x72xf32>, vector<72x128xf32>, vector<24x128xf32> -> vector<24x128xf32>
    %c1_i32_85 = arith.constant 1 : i32
    %146 = tpu.dynamic_rotate %116 by %c1_i32_85 dim 1 : vector<32x128xf32>, i32 -> vector<32x128xf32>
    %147 = vector.broadcast %17 : vector<1x128xf32> to vector<32x128xf32>
    %148 = arith.addf %146, %147 : vector<32x128xf32>
    %c127_i32_86 = arith.constant 127 : i32
    %149 = tpu.dynamic_rotate %116 by %c127_i32_86 dim 1 : vector<32x128xf32>, i32 -> vector<32x128xf32>
    %150 = vector.broadcast %19 : vector<1x128xf32> to vector<32x128xf32>
    %151 = arith.addf %149, %150 : vector<32x128xf32>
    %152 = arith.maximumf %148, %116 : vector<32x128xf32>
    %153 = arith.maximumf %152, %151 : vector<32x128xf32>
    %c0_87 = arith.constant 0 : index
    %c0_88 = arith.constant 0 : index
    %154 = vector.load %arg19[%c0_87, %c0_88] : memref<8x32xf32, #tpu.memory_space<vmem>>, vector<8x32xf32>
    %cst_89 = arith.constant dense<0.000000e+00> : vector<8x128xf32>
    %155 = tpu.matmul %154, %153, %cst_89 {dimension_numbers = #tpu.dot_dimension_numbers<[1], [0], [0], [1], [0, 0, 1, 1], [], []>} : vector<8x32xf32>, vector<32x128xf32>, vector<8x128xf32> -> vector<8x128xf32>
    %156 = tpu.concatenate %145, %155 in 0 : vector<24x128xf32>, vector<8x128xf32> -> vector<32x128xf32>
    %cst_90 = arith.constant 0.000000e+00 : f32
    %157 = vector.broadcast %cst_90 : f32 to vector<32x128xf32>
    %158 = arith.maximumf %156, %157 : vector<32x128xf32>
    %c0_91 = arith.constant 0 : index
    %c0_92 = arith.constant 0 : index
    %159 = vector.load %arg29[%c0_91, %c0_92] : memref<32x8xf32, #tpu.memory_space<vmem>>, vector<32x8xf32>
    %cst_93 = arith.constant dense<0.000000e+00> : vector<32x128xf32>
    %160 = tpu.matmul %159, %32, %cst_93 {dimension_numbers = #tpu.dot_dimension_numbers<[1], [0], [0], [1], [0, 0, 1, 1], [], []>} : vector<32x8xf32>, vector<8x128xf32>, vector<32x128xf32> -> vector<32x128xf32>
    %161 = arith.addf %158, %160 : vector<32x128xf32>
    %cst_94 = arith.constant 0.000000e+00 : f32
    %162 = vector.broadcast %cst_94 : f32 to vector<32x128xf32>
    %163 = arith.maximumf %161, %162 : vector<32x128xf32>
    %c0_95 = arith.constant 0 : index
    %c0_96 = arith.constant 0 : index
    %164 = vector.load %arg20[%c0_95, %c0_96] : memref<8x32xf32, #tpu.memory_space<vmem>>, vector<8x32xf32>
    %cst_97 = arith.constant dense<0.000000e+00> : vector<8x128xf32>
    %165 = tpu.matmul %164, %163, %cst_97 {dimension_numbers = #tpu.dot_dimension_numbers<[1], [0], [0], [1], [0, 0, 1, 1], [], []>} : vector<8x32xf32>, vector<32x128xf32>, vector<8x128xf32> -> vector<8x128xf32>
    %c4_i32_98 = arith.constant 4 : i32
    %166 = tpu.dynamic_rotate %165 by %c4_i32_98 dim 1 : vector<8x128xf32>, i32 -> vector<8x128xf32>
    %167 = vector.broadcast %1 : vector<1x128xf32> to vector<8x128xf32>
    %168 = arith.mulf %166, %167 : vector<8x128xf32>
    %c3_i32_99 = arith.constant 3 : i32
    %169 = tpu.dynamic_rotate %165 by %c3_i32_99 dim 1 : vector<8x128xf32>, i32 -> vector<8x128xf32>
    %170 = vector.broadcast %3 : vector<1x128xf32> to vector<8x128xf32>
    %171 = arith.mulf %169, %170 : vector<8x128xf32>
    %c2_i32_100 = arith.constant 2 : i32
    %172 = tpu.dynamic_rotate %165 by %c2_i32_100 dim 1 : vector<8x128xf32>, i32 -> vector<8x128xf32>
    %173 = vector.broadcast %5 : vector<1x128xf32> to vector<8x128xf32>
    %174 = arith.mulf %172, %173 : vector<8x128xf32>
    %c1_i32_101 = arith.constant 1 : i32
    %175 = tpu.dynamic_rotate %165 by %c1_i32_101 dim 1 : vector<8x128xf32>, i32 -> vector<8x128xf32>
    %176 = vector.broadcast %7 : vector<1x128xf32> to vector<8x128xf32>
    %177 = arith.mulf %175, %176 : vector<8x128xf32>
    %c127_i32_102 = arith.constant 127 : i32
    %178 = tpu.dynamic_rotate %165 by %c127_i32_102 dim 1 : vector<8x128xf32>, i32 -> vector<8x128xf32>
    %179 = vector.broadcast %9 : vector<1x128xf32> to vector<8x128xf32>
    %180 = arith.mulf %178, %179 : vector<8x128xf32>
    %c126_i32_103 = arith.constant 126 : i32
    %181 = tpu.dynamic_rotate %165 by %c126_i32_103 dim 1 : vector<8x128xf32>, i32 -> vector<8x128xf32>
    %182 = vector.broadcast %11 : vector<1x128xf32> to vector<8x128xf32>
    %183 = arith.mulf %181, %182 : vector<8x128xf32>
    %c125_i32_104 = arith.constant 125 : i32
    %184 = tpu.dynamic_rotate %165 by %c125_i32_104 dim 1 : vector<8x128xf32>, i32 -> vector<8x128xf32>
    %185 = vector.broadcast %13 : vector<1x128xf32> to vector<8x128xf32>
    %186 = arith.mulf %184, %185 : vector<8x128xf32>
    %c124_i32_105 = arith.constant 124 : i32
    %187 = tpu.dynamic_rotate %165 by %c124_i32_105 dim 1 : vector<8x128xf32>, i32 -> vector<8x128xf32>
    %188 = vector.broadcast %15 : vector<1x128xf32> to vector<8x128xf32>
    %189 = arith.mulf %187, %188 : vector<8x128xf32>
    %190 = tpu.concatenate %168, %171, %174, %177, %165, %180, %183, %186, %189 in 0 : vector<8x128xf32>, vector<8x128xf32>, vector<8x128xf32>, vector<8x128xf32>, vector<8x128xf32>, vector<8x128xf32>, vector<8x128xf32>, vector<8x128xf32>, vector<8x128xf32> -> vector<72x128xf32>
    %c0_106 = arith.constant 0 : index
    %c0_107 = arith.constant 0 : index
    %191 = vector.load %arg21[%c0_106, %c0_107] : memref<24x72xf32, #tpu.memory_space<vmem>>, vector<24x72xf32>
    %cst_108 = arith.constant dense<0.000000e+00> : vector<24x128xf32>
    %192 = tpu.matmul %191, %190, %cst_108 {dimension_numbers = #tpu.dot_dimension_numbers<[1], [0], [0], [1], [0, 0, 1, 1], [], []>} : vector<24x72xf32>, vector<72x128xf32>, vector<24x128xf32> -> vector<24x128xf32>
    %c1_i32_109 = arith.constant 1 : i32
    %193 = tpu.dynamic_rotate %163 by %c1_i32_109 dim 1 : vector<32x128xf32>, i32 -> vector<32x128xf32>
    %194 = vector.broadcast %17 : vector<1x128xf32> to vector<32x128xf32>
    %195 = arith.addf %193, %194 : vector<32x128xf32>
    %c127_i32_110 = arith.constant 127 : i32
    %196 = tpu.dynamic_rotate %163 by %c127_i32_110 dim 1 : vector<32x128xf32>, i32 -> vector<32x128xf32>
    %197 = vector.broadcast %19 : vector<1x128xf32> to vector<32x128xf32>
    %198 = arith.addf %196, %197 : vector<32x128xf32>
    %199 = arith.maximumf %195, %163 : vector<32x128xf32>
    %200 = arith.maximumf %199, %198 : vector<32x128xf32>
    %c0_111 = arith.constant 0 : index
    %c0_112 = arith.constant 0 : index
    %201 = vector.load %arg22[%c0_111, %c0_112] : memref<8x32xf32, #tpu.memory_space<vmem>>, vector<8x32xf32>
    %cst_113 = arith.constant dense<0.000000e+00> : vector<8x128xf32>
    %202 = tpu.matmul %201, %200, %cst_113 {dimension_numbers = #tpu.dot_dimension_numbers<[1], [0], [0], [1], [0, 0, 1, 1], [], []>} : vector<8x32xf32>, vector<32x128xf32>, vector<8x128xf32> -> vector<8x128xf32>
    %203 = tpu.concatenate %192, %202 in 0 : vector<24x128xf32>, vector<8x128xf32> -> vector<32x128xf32>
    %cst_114 = arith.constant 0.000000e+00 : f32
    %204 = vector.broadcast %cst_114 : f32 to vector<32x128xf32>
    %205 = arith.maximumf %203, %204 : vector<32x128xf32>
    %c0_115 = arith.constant 0 : index
    %c0_116 = arith.constant 0 : index
    %206 = vector.load %arg23[%c0_115, %c0_116] : memref<8x32xf32, #tpu.memory_space<vmem>>, vector<8x32xf32>
    %cst_117 = arith.constant dense<0.000000e+00> : vector<8x128xf32>
    %207 = tpu.matmul %206, %205, %cst_117 {dimension_numbers = #tpu.dot_dimension_numbers<[1], [0], [0], [1], [0, 0, 1, 1], [], []>} : vector<8x32xf32>, vector<32x128xf32>, vector<8x128xf32> -> vector<8x128xf32>
    %c4_i32_118 = arith.constant 4 : i32
    %208 = tpu.dynamic_rotate %207 by %c4_i32_118 dim 1 : vector<8x128xf32>, i32 -> vector<8x128xf32>
    %209 = vector.broadcast %1 : vector<1x128xf32> to vector<8x128xf32>
    %210 = arith.mulf %208, %209 : vector<8x128xf32>
    %c3_i32_119 = arith.constant 3 : i32
    %211 = tpu.dynamic_rotate %207 by %c3_i32_119 dim 1 : vector<8x128xf32>, i32 -> vector<8x128xf32>
    %212 = vector.broadcast %3 : vector<1x128xf32> to vector<8x128xf32>
    %213 = arith.mulf %211, %212 : vector<8x128xf32>
    %c2_i32_120 = arith.constant 2 : i32
    %214 = tpu.dynamic_rotate %207 by %c2_i32_120 dim 1 : vector<8x128xf32>, i32 -> vector<8x128xf32>
    %215 = vector.broadcast %5 : vector<1x128xf32> to vector<8x128xf32>
    %216 = arith.mulf %214, %215 : vector<8x128xf32>
    %c1_i32_121 = arith.constant 1 : i32
    %217 = tpu.dynamic_rotate %207 by %c1_i32_121 dim 1 : vector<8x128xf32>, i32 -> vector<8x128xf32>
    %218 = vector.broadcast %7 : vector<1x128xf32> to vector<8x128xf32>
    %219 = arith.mulf %217, %218 : vector<8x128xf32>
    %c127_i32_122 = arith.constant 127 : i32
    %220 = tpu.dynamic_rotate %207 by %c127_i32_122 dim 1 : vector<8x128xf32>, i32 -> vector<8x128xf32>
    %221 = vector.broadcast %9 : vector<1x128xf32> to vector<8x128xf32>
    %222 = arith.mulf %220, %221 : vector<8x128xf32>
    %c126_i32_123 = arith.constant 126 : i32
    %223 = tpu.dynamic_rotate %207 by %c126_i32_123 dim 1 : vector<8x128xf32>, i32 -> vector<8x128xf32>
    %224 = vector.broadcast %11 : vector<1x128xf32> to vector<8x128xf32>
    %225 = arith.mulf %223, %224 : vector<8x128xf32>
    %c125_i32_124 = arith.constant 125 : i32
    %226 = tpu.dynamic_rotate %207 by %c125_i32_124 dim 1 : vector<8x128xf32>, i32 -> vector<8x128xf32>
    %227 = vector.broadcast %13 : vector<1x128xf32> to vector<8x128xf32>
    %228 = arith.mulf %226, %227 : vector<8x128xf32>
    %c124_i32_125 = arith.constant 124 : i32
    %229 = tpu.dynamic_rotate %207 by %c124_i32_125 dim 1 : vector<8x128xf32>, i32 -> vector<8x128xf32>
    %230 = vector.broadcast %15 : vector<1x128xf32> to vector<8x128xf32>
    %231 = arith.mulf %229, %230 : vector<8x128xf32>
    %232 = tpu.concatenate %210, %213, %216, %219, %207, %222, %225, %228, %231 in 0 : vector<8x128xf32>, vector<8x128xf32>, vector<8x128xf32>, vector<8x128xf32>, vector<8x128xf32>, vector<8x128xf32>, vector<8x128xf32>, vector<8x128xf32>, vector<8x128xf32> -> vector<72x128xf32>
    %c0_126 = arith.constant 0 : index
    %c0_127 = arith.constant 0 : index
    %233 = vector.load %arg24[%c0_126, %c0_127] : memref<24x72xf32, #tpu.memory_space<vmem>>, vector<24x72xf32>
    %cst_128 = arith.constant dense<0.000000e+00> : vector<24x128xf32>
    %234 = tpu.matmul %233, %232, %cst_128 {dimension_numbers = #tpu.dot_dimension_numbers<[1], [0], [0], [1], [0, 0, 1, 1], [], []>} : vector<24x72xf32>, vector<72x128xf32>, vector<24x128xf32> -> vector<24x128xf32>
    %c1_i32_129 = arith.constant 1 : i32
    %235 = tpu.dynamic_rotate %205 by %c1_i32_129 dim 1 : vector<32x128xf32>, i32 -> vector<32x128xf32>
    %236 = vector.broadcast %17 : vector<1x128xf32> to vector<32x128xf32>
    %237 = arith.addf %235, %236 : vector<32x128xf32>
    %c127_i32_130 = arith.constant 127 : i32
    %238 = tpu.dynamic_rotate %205 by %c127_i32_130 dim 1 : vector<32x128xf32>, i32 -> vector<32x128xf32>
    %239 = vector.broadcast %19 : vector<1x128xf32> to vector<32x128xf32>
    %240 = arith.addf %238, %239 : vector<32x128xf32>
    %241 = arith.maximumf %237, %205 : vector<32x128xf32>
    %242 = arith.maximumf %241, %240 : vector<32x128xf32>
    %c0_131 = arith.constant 0 : index
    %c0_132 = arith.constant 0 : index
    %243 = vector.load %arg25[%c0_131, %c0_132] : memref<8x32xf32, #tpu.memory_space<vmem>>, vector<8x32xf32>
    %cst_133 = arith.constant dense<0.000000e+00> : vector<8x128xf32>
    %244 = tpu.matmul %243, %242, %cst_133 {dimension_numbers = #tpu.dot_dimension_numbers<[1], [0], [0], [1], [0, 0, 1, 1], [], []>} : vector<8x32xf32>, vector<32x128xf32>, vector<8x128xf32> -> vector<8x128xf32>
    %245 = tpu.concatenate %234, %244 in 0 : vector<24x128xf32>, vector<8x128xf32> -> vector<32x128xf32>
    %cst_134 = arith.constant 0.000000e+00 : f32
    %246 = vector.broadcast %cst_134 : f32 to vector<32x128xf32>
    %247 = arith.maximumf %245, %246 : vector<32x128xf32>
    %c0_135 = arith.constant 0 : index
    %c0_136 = arith.constant 0 : index
    %248 = vector.load %arg26[%c0_135, %c0_136] : memref<8x32xf32, #tpu.memory_space<vmem>>, vector<8x32xf32>
    %cst_137 = arith.constant dense<0.000000e+00> : vector<8x128xf32>
    %249 = tpu.matmul %248, %247, %cst_137 {dimension_numbers = #tpu.dot_dimension_numbers<[1], [0], [0], [1], [0, 0, 1, 1], [], []>} : vector<8x32xf32>, vector<32x128xf32>, vector<8x128xf32> -> vector<8x128xf32>
    %c4_i32_138 = arith.constant 4 : i32
    %250 = tpu.dynamic_rotate %249 by %c4_i32_138 dim 1 : vector<8x128xf32>, i32 -> vector<8x128xf32>
    %251 = vector.broadcast %1 : vector<1x128xf32> to vector<8x128xf32>
    %252 = arith.mulf %250, %251 : vector<8x128xf32>
    %c3_i32_139 = arith.constant 3 : i32
    %253 = tpu.dynamic_rotate %249 by %c3_i32_139 dim 1 : vector<8x128xf32>, i32 -> vector<8x128xf32>
    %254 = vector.broadcast %3 : vector<1x128xf32> to vector<8x128xf32>
    %255 = arith.mulf %253, %254 : vector<8x128xf32>
    %c2_i32_140 = arith.constant 2 : i32
    %256 = tpu.dynamic_rotate %249 by %c2_i32_140 dim 1 : vector<8x128xf32>, i32 -> vector<8x128xf32>
    %257 = vector.broadcast %5 : vector<1x128xf32> to vector<8x128xf32>
    %258 = arith.mulf %256, %257 : vector<8x128xf32>
    %c1_i32_141 = arith.constant 1 : i32
    %259 = tpu.dynamic_rotate %249 by %c1_i32_141 dim 1 : vector<8x128xf32>, i32 -> vector<8x128xf32>
    %260 = vector.broadcast %7 : vector<1x128xf32> to vector<8x128xf32>
    %261 = arith.mulf %259, %260 : vector<8x128xf32>
    %c127_i32_142 = arith.constant 127 : i32
    %262 = tpu.dynamic_rotate %249 by %c127_i32_142 dim 1 : vector<8x128xf32>, i32 -> vector<8x128xf32>
    %263 = vector.broadcast %9 : vector<1x128xf32> to vector<8x128xf32>
    %264 = arith.mulf %262, %263 : vector<8x128xf32>
    %c126_i32_143 = arith.constant 126 : i32
    %265 = tpu.dynamic_rotate %249 by %c126_i32_143 dim 1 : vector<8x128xf32>, i32 -> vector<8x128xf32>
    %266 = vector.broadcast %11 : vector<1x128xf32> to vector<8x128xf32>
    %267 = arith.mulf %265, %266 : vector<8x128xf32>
    %c125_i32_144 = arith.constant 125 : i32
    %268 = tpu.dynamic_rotate %249 by %c125_i32_144 dim 1 : vector<8x128xf32>, i32 -> vector<8x128xf32>
    %269 = vector.broadcast %13 : vector<1x128xf32> to vector<8x128xf32>
    %270 = arith.mulf %268, %269 : vector<8x128xf32>
    %c124_i32_145 = arith.constant 124 : i32
    %271 = tpu.dynamic_rotate %249 by %c124_i32_145 dim 1 : vector<8x128xf32>, i32 -> vector<8x128xf32>
    %272 = vector.broadcast %15 : vector<1x128xf32> to vector<8x128xf32>
    %273 = arith.mulf %271, %272 : vector<8x128xf32>
    %274 = tpu.concatenate %252, %255, %258, %261, %249, %264, %267, %270, %273 in 0 : vector<8x128xf32>, vector<8x128xf32>, vector<8x128xf32>, vector<8x128xf32>, vector<8x128xf32>, vector<8x128xf32>, vector<8x128xf32>, vector<8x128xf32>, vector<8x128xf32> -> vector<72x128xf32>
    %c0_146 = arith.constant 0 : index
    %c0_147 = arith.constant 0 : index
    %275 = vector.load %arg27[%c0_146, %c0_147] : memref<24x72xf32, #tpu.memory_space<vmem>>, vector<24x72xf32>
    %cst_148 = arith.constant dense<0.000000e+00> : vector<24x128xf32>
    %276 = tpu.matmul %275, %274, %cst_148 {dimension_numbers = #tpu.dot_dimension_numbers<[1], [0], [0], [1], [0, 0, 1, 1], [], []>} : vector<24x72xf32>, vector<72x128xf32>, vector<24x128xf32> -> vector<24x128xf32>
    %c1_i32_149 = arith.constant 1 : i32
    %277 = tpu.dynamic_rotate %247 by %c1_i32_149 dim 1 : vector<32x128xf32>, i32 -> vector<32x128xf32>
    %278 = vector.broadcast %17 : vector<1x128xf32> to vector<32x128xf32>
    %279 = arith.addf %277, %278 : vector<32x128xf32>
    %c127_i32_150 = arith.constant 127 : i32
    %280 = tpu.dynamic_rotate %247 by %c127_i32_150 dim 1 : vector<32x128xf32>, i32 -> vector<32x128xf32>
    %281 = vector.broadcast %19 : vector<1x128xf32> to vector<32x128xf32>
    %282 = arith.addf %280, %281 : vector<32x128xf32>
    %283 = arith.maximumf %279, %247 : vector<32x128xf32>
    %284 = arith.maximumf %283, %282 : vector<32x128xf32>
    %c0_151 = arith.constant 0 : index
    %c0_152 = arith.constant 0 : index
    %285 = vector.load %arg28[%c0_151, %c0_152] : memref<8x32xf32, #tpu.memory_space<vmem>>, vector<8x32xf32>
    %cst_153 = arith.constant dense<0.000000e+00> : vector<8x128xf32>
    %286 = tpu.matmul %285, %284, %cst_153 {dimension_numbers = #tpu.dot_dimension_numbers<[1], [0], [0], [1], [0, 0, 1, 1], [], []>} : vector<8x32xf32>, vector<32x128xf32>, vector<8x128xf32> -> vector<8x128xf32>
    %287 = tpu.concatenate %276, %286 in 0 : vector<24x128xf32>, vector<8x128xf32> -> vector<32x128xf32>
    %cst_154 = arith.constant 0.000000e+00 : f32
    %288 = vector.broadcast %cst_154 : f32 to vector<32x128xf32>
    %289 = arith.maximumf %287, %288 : vector<32x128xf32>
    %cst_155 = arith.constant 0.999994993 : f32
    %290 = vector.broadcast %cst_155 : f32 to vector<32x128xf32>
    %291 = arith.mulf %163, %290 : vector<32x128xf32>
    %292 = arith.addf %289, %291 : vector<32x128xf32>
    %cst_156 = arith.constant 0.000000e+00 : f32
    %293 = vector.broadcast %cst_156 : f32 to vector<32x128xf32>
    %294 = arith.maximumf %292, %293 : vector<32x128xf32>
    %c0_157 = arith.constant 0 : index
    %c0_158 = arith.constant 0 : index
    %295 = vector.load %arg8[%c0_157, %c0_158] : memref<128x2xf32, #tpu.memory_space<vmem>>, vector<128x2xf32>
    %cst_159 = arith.constant dense<0.000000e+00> : vector<32x2xf32>
    %296 = tpu.matmul %294, %295, %cst_159 {dimension_numbers = #tpu.dot_dimension_numbers<[1], [0], [0], [1], [0, 0, 1, 1], [], []>} : vector<32x128xf32>, vector<128x2xf32>, vector<32x2xf32> -> vector<32x2xf32>
    %c0_160 = arith.constant 0 : index
    %c0_161 = arith.constant 0 : index
    %297 = vector.load %arg30[%c0_160, %c0_161] : memref<4x32xf32, #tpu.memory_space<vmem>>, vector<4x32xf32>
    %cst_162 = arith.constant dense<0.000000e+00> : vector<4x2xf32>
    %298 = tpu.matmul %297, %296, %cst_162 {dimension_numbers = #tpu.dot_dimension_numbers<[1], [0], [0], [1], [0, 0, 1, 1], [], []>} : vector<4x32xf32>, vector<32x2xf32>, vector<4x2xf32> -> vector<4x2xf32>
    %c0_163 = arith.constant 0 : index
    %c0_164 = arith.constant 0 : index
    %299 = vector.load %arg31[%c0_163, %c0_164] : memref<4x1xf32, #tpu.memory_space<vmem>>, vector<4x1xf32>
    %300 = vector.broadcast %299 : vector<4x1xf32> to vector<4x2xf32>
    %301 = arith.addf %298, %300 : vector<4x2xf32>
    %c0_165 = arith.constant 0 : index
    %c0_166 = arith.constant 0 : index
    %302 = vector.load %arg32[%c0_165, %c0_166] : memref<4x2xf32, #tpu.memory_space<vmem>>, vector<4x2xf32>
    tpu.vector_store %arg32[%c0_165, %c0_166], %301 {strides = array<i32>} : memref<4x2xf32, #tpu.memory_space<vmem>>, vector<4x2xf32>,
    return
  }
  func.func @transform_0(%arg0: i32) -> (i32, i32) {
    %c0_i32 = arith.constant 0 : i32
    %c0_i32_0 = arith.constant 0 : i32
    %c0_i32_1 = arith.constant 0 : i32
    return %c0_i32, %c0_i32_0 : i32, i32
  }
  func.func @transform_1(%arg0: i32) -> (i32, i32) {
    %c0_i32 = arith.constant 0 : i32
    %c0_i32_0 = arith.constant 0 : i32
    %c0_i32_1 = arith.constant 0 : i32
    return %c0_i32, %c0_i32_0 : i32, i32
  }
  func.func @transform_2(%arg0: i32) -> (i32, i32) {
    %c0_i32 = arith.constant 0 : i32
    %c0_i32_0 = arith.constant 0 : i32
    %c0_i32_1 = arith.constant 0 : i32
    return %c0_i32, %c0_i32_0 : i32, i32
  }
  func.func @transform_3(%arg0: i32) -> (i32, i32) {
    %c0_i32 = arith.constant 0 : i32
    %c0_i32_0 = arith.constant 0 : i32
    %c0_i32_1 = arith.constant 0 : i32
    return %c0_i32, %c0_i32_0 : i32, i32
  }
  func.func @transform_4(%arg0: i32) -> (i32, i32) {
    %c0_i32 = arith.constant 0 : i32
    %c0_i32_0 = arith.constant 0 : i32
    %c0_i32_1 = arith.constant 0 : i32
    return %c0_i32, %c0_i32_0 : i32, i32
  }
  func.func @transform_5(%arg0: i32) -> (i32, i32) {
    %c0_i32 = arith.constant 0 : i32
    %c0_i32_0 = arith.constant 0 : i32
    %c0_i32_1 = arith.constant 0 : i32
    return %c0_i32, %c0_i32_0 : i32, i32
  }
  func.func @transform_6(%arg0: i32) -> (i32, i32) {
    %c0_i32 = arith.constant 0 : i32
    %c0_i32_0 = arith.constant 0 : i32
    %c0_i32_1 = arith.constant 0 : i32
    return %c0_i32, %c0_i32_0 : i32, i32
  }
  func.func @transform_7(%arg0: i32) -> (i32, i32) {
    %c0_i32 = arith.constant 0 : i32
    %c0_i32_0 = arith.constant 0 : i32
    %c0_i32_1 = arith.constant 0 : i32
    return %c0_i32, %c0_i32_0 : i32, i32
  }
  func.func @transform_8(%arg0: i32) -> (i32, i32, i32) {
    %c0_i32 = arith.constant 0 : i32
    %c0_i32_0 = arith.constant 0 : i32
    %c0_i32_1 = arith.constant 0 : i32
    %c0_i32_2 = arith.constant 0 : i32
    return %c0_i32, %c0_i32_0, %c0_i32_1 : i32, i32, i32
  }
  func.func @transform_9(%arg0: i32) -> (i32, i32, i32) {
    %c0_i32 = arith.constant 0 : i32
    %c0_i32_0 = arith.constant 0 : i32
    %c0_i32_1 = arith.constant 0 : i32
    %c0_i32_2 = arith.constant 0 : i32
    return %c0_i32, %c0_i32_0, %c0_i32_1 : i32, i32, i32
  }
  func.func @transform_10(%arg0: i32) -> (i32, i32) {
    %c0_i32 = arith.constant 0 : i32
    %c0_i32_0 = arith.constant 0 : i32
    %c0_i32_1 = arith.constant 0 : i32
    return %c0_i32, %c0_i32_0 : i32, i32
  }
  func.func @transform_11(%arg0: i32) -> (i32, i32) {
    %c0_i32 = arith.constant 0 : i32
    %c0_i32_0 = arith.constant 0 : i32
    %c0_i32_1 = arith.constant 0 : i32
    return %c0_i32, %c0_i32_0 : i32, i32
  }
  func.func @transform_12(%arg0: i32) -> (i32, i32) {
    %c0_i32 = arith.constant 0 : i32
    %c0_i32_0 = arith.constant 0 : i32
    %c0_i32_1 = arith.constant 0 : i32
    return %c0_i32, %c0_i32_0 : i32, i32
  }
  func.func @transform_13(%arg0: i32) -> (i32, i32) {
    %c0_i32 = arith.constant 0 : i32
    %c0_i32_0 = arith.constant 0 : i32
    %c0_i32_1 = arith.constant 0 : i32
    return %c0_i32, %c0_i32_0 : i32, i32
  }
  func.func @transform_14(%arg0: i32) -> (i32, i32) {
    %c0_i32 = arith.constant 0 : i32
    %c0_i32_0 = arith.constant 0 : i32
    %c0_i32_1 = arith.constant 0 : i32
    return %c0_i32, %c0_i32_0 : i32, i32
  }
  func.func @transform_15(%arg0: i32) -> (i32, i32) {
    %c0_i32 = arith.constant 0 : i32
    %c0_i32_0 = arith.constant 0 : i32
    %c0_i32_1 = arith.constant 0 : i32
    return %c0_i32, %c0_i32_0 : i32, i32
  }
  func.func @transform_16(%arg0: i32) -> (i32, i32) {
    %c0_i32 = arith.constant 0 : i32
    %c0_i32_0 = arith.constant 0 : i32
    %c0_i32_1 = arith.constant 0 : i32
    return %c0_i32, %c0_i32_0 : i32, i32
  }
  func.func @transform_17(%arg0: i32) -> (i32, i32) {
    %c0_i32 = arith.constant 0 : i32
    %c0_i32_0 = arith.constant 0 : i32
    %c0_i32_1 = arith.constant 0 : i32
    return %c0_i32, %c0_i32_0 : i32, i32
  }
  func.func @transform_18(%arg0: i32) -> (i32, i32) {
    %c0_i32 = arith.constant 0 : i32
    %c0_i32_0 = arith.constant 0 : i32
    %c0_i32_1 = arith.constant 0 : i32
    return %c0_i32, %c0_i32_0 : i32, i32
  }
  func.func @transform_19(%arg0: i32) -> (i32, i32) {
    %c0_i32 = arith.constant 0 : i32
    %c0_i32_0 = arith.constant 0 : i32
    %c0_i32_1 = arith.constant 0 : i32
    return %c0_i32, %c0_i32_0 : i32, i32
  }
  func.func @transform_20(%arg0: i32) -> (i32, i32) {
    %c0_i32 = arith.constant 0 : i32
    %c0_i32_0 = arith.constant 0 : i32
    %c0_i32_1 = arith.constant 0 : i32
    return %c0_i32, %c0_i32_0 : i32, i32
  }
  func.func @transform_21(%arg0: i32) -> (i32, i32) {
    %c0_i32 = arith.constant 0 : i32
    %c0_i32_0 = arith.constant 0 : i32
    %c0_i32_1 = arith.constant 0 : i32
    return %c0_i32, %c0_i32_0 : i32, i32
  }
  func.func @transform_22(%arg0: i32) -> (i32, i32) {
    %c0_i32 = arith.constant 0 : i32
    %c0_i32_0 = arith.constant 0 : i32
    %c0_i32_1 = arith.constant 0 : i32
    return %c0_i32, %c0_i32_0 : i32, i32
  }
  func.func @transform_23(%arg0: i32) -> (i32, i32) {
    %c0_i32 = arith.constant 0 : i32
    %c0_i32_0 = arith.constant 0 : i32
    %c0_i32_1 = arith.constant 0 : i32
    return %c0_i32, %c0_i32_0 : i32, i32
  }
  func.func @transform_24(%arg0: i32) -> (i32, i32) {
    %c0_i32 = arith.constant 0 : i32
    %c0_i32_0 = arith.constant 0 : i32
    %c0_i32_1 = arith.constant 0 : i32
    return %c0_i32, %c0_i32_0 : i32, i32
  }
  func.func @transform_25(%arg0: i32) -> (i32, i32) {
    %c0_i32 = arith.constant 0 : i32
    %c0_i32_0 = arith.constant 0 : i32
    %c0_i32_1 = arith.constant 0 : i32
    return %c0_i32, %c0_i32_0 : i32, i32
  }
  func.func @transform_26(%arg0: i32) -> (i32, i32) {
    %c0_i32 = arith.constant 0 : i32
    %c0_i32_0 = arith.constant 0 : i32
    %c0_i32_1 = arith.constant 0 : i32
    return %c0_i32, %c0_i32_0 : i32, i32
  }
  func.func @transform_27(%arg0: i32) -> (i32, i32) {
    %c0_i32 = arith.constant 0 : i32
    %c0_i32_0 = arith.constant 0 : i32
    %c0_i32_1 = arith.constant 0 : i32
    return %c0_i32, %c0_i32_0 : i32, i32
  }
  func.func @transform_28(%arg0: i32) -> (i32, i32) {
    %c0_i32 = arith.constant 0 : i32
    %c0_i32_0 = arith.constant 0 : i32
    %c0_i32_1 = arith.constant 0 : i32
    return %c0_i32, %c0_i32_0 : i32, i32
  }
  func.func @transform_29(%arg0: i32) -> (i32, i32) {
    %c0_i32 = arith.constant 0 : i32
    %c0_i32_0 = arith.constant 0 : i32
    %c0_i32_1 = arith.constant 0 : i32
    return %c0_i32, %c0_i32_0 : i32, i32
  }
  func.func @transform_30(%arg0: i32) -> (i32, i32) {
    %c0_i32 = arith.constant 0 : i32
    %c0_i32_0 = arith.constant 0 : i32
    %c0_i32_1 = arith.constant 0 : i32
    return %c0_i32, %c0_i32_0 : i32, i32
  }
  func.func @transform_31(%arg0: i32) -> (i32, i32) {
    %c0_i32 = arith.constant 0 : i32
    %c0_i32_0 = arith.constant 0 : i32
    %c0_i32_1 = arith.constant 0 : i32
    return %c0_i32, %c0_i32_0 : i32, i32
  }
}

</mosaic_0001>

<bundles_post_ra>
// kernel: fwd.1
= control target key start
LH: loop header
LB: loop body
LE: loop exit
PB: predicated region body
PF: predicated region fallthrough
CT: control target
= control target key end

     0   :  { %s4009_s6 = smov 1   ;;  %s4010_s10 = smov 2   ;;  %s4822_s0 = inlined_call_operand.smem [shape: u32[32], index: -1, kind: input, shape index: {}] }
   0x1   :  { %s4083_s5 = sld [smem:[%s4822_s0]]   ;;  %s4011_s14 = smov 3  }
   0x2   :  { %s4088_s9 = sld [smem:[%s4822_s0 + %s4009_s6]]   ;;  %s4012_s18 = smov 4  }
   0x3   :  { %s4093_s13 = sld [smem:[%s4822_s0 + %s4010_s10]]   ;;  %s4013_s22 = smov 5  }
   0x4   :  { %s4098_s17 = sld [smem:[%s4822_s0 + %s4011_s14]]   ;;  %s4014_s26 = smov 6  }
   0x5   :  { %s4103_s21 = sld [smem:[%s4822_s0 + %s4012_s18]]   ;;  %s4015_s30 = smov 7  }
   0x6   :  { %s4108_s25 = sld [smem:[%s4822_s0 + %s4013_s22]]   ;;  %s4016_s4 = smov 8  }
   0x7   :  { %4827 = sst [smem:[#allocation45_spill]] %s4083_s5  ;;  %s4017_s10 = smov 9  }
   0x8   :  { %4828 = sst [smem:[#allocation46_spill]] %s4088_s9  ;;  %s4018_s15 = smov 10  }
   0x9   :  { %4829 = sst [smem:[#allocation47_spill]] %s4093_s13  ;;  %s4019_s20 = smov 11  }
   0xa   :  { %s4113_s29 = sld [smem:[%s4822_s0 + %s4014_s26]]   ;;  %s4020_s26 = smov 12  }
   0xb   :  { %s4118_s3 = sld [smem:[%s4822_s0 + %s4015_s30]]   ;;  %s4021_s1 = smov 13  }
   0xc   :  { %4830 = sst [smem:[#allocation48_spill]] %s4108_s25  ;;  %s4022_s7 = smov 14  }
   0xd   :  { %s4123_s8 = sld [smem:[%s4822_s0 + %s4016_s4]]   ;;  %s4024_s22 = smov 16  }
   0xe   :  { %s4128_s14 = sld [smem:[%s4822_s0 + %s4017_s10]]   ;;  %s4025_s28 = smov 17  }
   0xf   :  { %s4133_s19 = sld [smem:[%s4822_s0 + %s4018_s15]]   ;;  %s4023_s15 = smov 15  }
  0x10   :  { %4831 = sst [smem:[#allocation49_spill]] %s4113_s29 }
  0x11   :  { %4832 = sst [smem:[#allocation50_spill]] %s4118_s3 }
  0x12   :  { %s4138_s24 = sld [smem:[%s4822_s0 + %s4019_s20]]  }
  0x13   :  { %s4143_s30 = sld [smem:[%s4822_s0 + %s4020_s26]]  }
  0x14   :  { %s4148_s6 = sld [smem:[%s4822_s0 + %s4021_s1]]  }
  0x15   :  { %s4153_s12 = sld [smem:[%s4822_s0 + %s4022_s7]]   ;;  %s4026_s7 = smov 18  }
  0x16   :  { %s4158_s20 = sld [smem:[%s4822_s0 + %s4023_s15]]   ;;  %s4027_s15 = smov 19  }
  0x17   :  { %s4163_s27 = sld [smem:[%s4822_s0 + %s4024_s22]]   ;;  %s4028_s22 = smov 20  }
  0x18   :  { %4833 = sst [smem:[#allocation51_spill]] %s4138_s24 }
  0x19   :  { %s4168_s4 = sld [smem:[%s4822_s0 + %s4025_s28]]   ;;  %s4029_s28 = smov 21  }
  0x1a   :  { %s4173_s3 = sld [smem:[%s4822_s0 + %s4026_s7]]   ;;  %s4030_s7 = smov 22  }
  0x1b   :  { %4834 = sst [smem:[#allocation52_spill]] %s4153_s12 }
  0x1c   :  { %s4178_s12 = sld [smem:[%s4822_s0 + %s4027_s15]]   ;;  %s4031_s15 = smov 23  }
  0x1d   :  { %4835 = sst [smem:[#allocation53_spill]] %s4163_s27 }
  0x1e   :  { %s4183_s24 = sld [smem:[%s4822_s0 + %s4028_s22]]   ;;  %s4032_s22 = smov 24  }
  0x1f   :  { %s4188_s29 = sld [smem:[%s4822_s0 + %s4029_s28]]   ;;  %s4033_s28 = smov 25  }
  0x20   :  { %4836 = sst [smem:[#allocation54_spill]] %s4173_s3 }
  0x21   :  { %s4193_s25 = sld [smem:[%s4822_s0 + %s4030_s7]]   ;;  %s4034_s7 = smov 26  }
  0x22   :  { %s4198_s13 = sld [smem:[%s4822_s0 + %s4031_s15]]   ;;  %s4035_s15 = smov 27  }
  0x23   :  { %s4203_s5 = sld [smem:[%s4822_s0 + %s4032_s22]]   ;;  %s4036_s22 = smov 28  }
  0x24   :  { %4837 = sst [smem:[#allocation55_spill]] %s4183_s24 }
  0x25   :  { %s4208_s9 = sld [smem:[%s4822_s0 + %s4033_s28]]   ;;  %s4037_s28 = smov 29  }
  0x26   :  { %s4218_s24 = sld [smem:[%s4822_s0 + %s4035_s15]]   ;;  %s4039_s15 = smov 31  }
  0x27   :  { %4838 = sst [smem:[#allocation56_spill]] %s4193_s25 }
  0x28   :  { %s4213_s25 = sld [smem:[%s4822_s0 + %s4034_s7]]   ;;  %s4038_s7 = smov 30  }
  0x29   :  { %4839 = sst [smem:[#allocation57_spill]] %s4203_s5 }
  0x2a   :  { %s4223_s5 = sld [smem:[%s4822_s0 + %s4036_s22]]  }
  0x2b   :  { %s4228_s3 = sld [smem:[%s4822_s0 + %s4037_s28]]  }
  0x2c   :  { %s4238_s27 = sld [smem:[%s4822_s0 + %s4039_s15]]  }
  0x2e   :  { %4840 = sst [smem:[#allocation58_spill]] %s4213_s25 }
  0x2f   :  { %s4233_s25 = sld [smem:[%s4822_s0 + %s4038_s7]]  }
  0x30   :  { %68 = vsyncpa [#allocation3], 0 }
  0x31   :  { %69 = vsyncpa [#allocation5], 0 }
  0x32   :  { %70 = vsyncpa [#allocation8], 0 }
  0x33   :  { %71 = vsyncpa [#allocation11], 0 }
  0x34   :  { %72 = vsyncpa [#allocation14], 0 }
  0x35   :  { %73 = vsyncpa [#allocation17], 0 }
  0x36   :  { %74 = vsyncpa [#allocation20], 0 }
  0x37   :  { %75 = vsyncpa [#allocation23], 0 }
  0x38   :  { %76 = vsyncpa [#allocation26], 0 }
  0x39   :  { %77 = vsyncpa [#allocation29], 0 }
  0x3a   :  { %78 = vsyncpa [#allocation32], 0  ;;  %s4040_s22 = smov [#allocation4]  }
  0x3b   :  { %s101_s23 = sshll.u32 %s4040_s22, 4  ;;  %s102_s23 = int_to_ptr.vmem [resolvable:$true] %s101_s23 }
  0x3c   :  { %s3575_s26 = scalar_lea.vmem %s102_s23, 128  ;;  %p3580_p1 = scmp.lt.s32.totalorder %s102_s23, %s102_s23 }
  0x3d   :  { %p3576_p0 = scmp.ne.s32.totalorder %s102_s23, %s3575_s26  ;;  %p3581_p2 = scmp.lt.s32.totalorder %s3575_s26, %s3575_s26 }
  0x3f   :  { %p3582_p3 = por %p3581_p2, %p3580_p1 }
  0x41   :  { %p3583_p4 = pnand %p3582_p3, %p3576_p0 }
  0x43   :  { %3586 = shalt.err (!%p3583_p4)
}
  0x44   :  { %104 = dma.hbm_to_vmem [thread:$0]  %s4103_s21, 128, %s102_s23, [#allocation5]  }
  0x45   :  { %s4041_s0 = smov [#allocation7]   ;;  %s4042_s1 = smov [#allocation10]  }
  0x46   :  { %s128_s28 = sshll.u32 %s4041_s0, 4  ;;  %s153_s2 = sshll.u32 %s4042_s1, 4  ;;  %s129_s28 = int_to_ptr.vmem [resolvable:$true] %s128_s28  ;;  %s154_s2 = int_to_ptr.vmem [resolvable:$true] %s153_s2 }
  0x47   :  { %s3595_s7 = scalar_lea.vmem %s129_s28, 32  ;;  %p3600_p6 = scmp.lt.s32.totalorder %s129_s28, %s129_s28 }
  0x48   :  { %p3596_p5 = scmp.ne.s32.totalorder %s129_s28, %s3595_s7  ;;  %p3601_p7 = scmp.lt.s32.totalorder %s3595_s7, %s3595_s7 }
  0x4a   :  { %p3602_p8 = por %p3601_p7, %p3600_p6 }
  0x4c   :  { %p3603_p9 = pnand %p3602_p8, %p3596_p5 }
  0x4e   :  { %3606 = shalt.err (!%p3603_p9)
}
  0x4f   :  { %s4043_s10 = smov 16   ;;  %s4044_s11 = smov 1  }
  0x50   :  { %134 = dma.hbm_to_vmem [thread:$0]  %s4128_s14, 32, %s129_s28, [#allocation8], %s4043_s10, %s4043_s10, %s4044_s11  }
  0x51   :  { %s3615_s21 = scalar_lea.vmem %s154_s2, 128  ;;  %p3620_p11 = scmp.lt.s32.totalorder %s154_s2, %s154_s2 }
  0x52   :  { %p3616_p10 = scmp.ne.s32.totalorder %s154_s2, %s3615_s21  ;;  %p3621_p12 = scmp.lt.s32.totalorder %s3615_s21, %s3615_s21 }
  0x54   :  { %p3622_p13 = por %p3621_p12, %p3620_p11 }
  0x56   :  { %p3623_p0 = pnand %p3622_p13, %p3616_p10 }
  0x58   :  { %3626 = shalt.err (!%p3623_p0)
}
  0x59   :  { %156 = dma.hbm_to_vmem [thread:$0]  %s4143_s30, 128, %s154_s2, [#allocation11]  }
  0x5a   :  { %s4045_s15 = smov [#allocation13]   ;;  %s4046_s18 = smov [#allocation16]  }
  0x5b   :  { %s175_s16 = sshll.u32 %s4045_s15, 4  ;;  %s194_s22 = sshll.u32 %s4046_s18, 4  ;;  %s176_s16 = int_to_ptr.vmem [resolvable:$true] %s175_s16  ;;  %s195_s22 = int_to_ptr.vmem [resolvable:$true] %s194_s22 }
  0x5c   :  { %s3635_s23 = scalar_lea.vmem %s176_s16, 128  ;;  %p3640_p2 = scmp.lt.s32.totalorder %s176_s16, %s176_s16 }
  0x5d   :  { %p3636_p1 = scmp.ne.s32.totalorder %s176_s16, %s3635_s23  ;;  %p3641_p3 = scmp.lt.s32.totalorder %s3635_s23, %s3635_s23 }
  0x5f   :  { %p3642_p4 = por %p3641_p3, %p3640_p2 }
  0x61   :  { %p3643_p5 = pnand %p3642_p4, %p3636_p1 }
  0x63   :  { %3646 = shalt.err (!%p3643_p5)
}
  0x64   :  { %178 = dma.hbm_to_vmem [thread:$0]  %s4158_s20, 128, %s176_s16, [#allocation14]  }
  0x65   :  { %s3655_s14 = scalar_lea.vmem %s195_s22, 384  ;;  %p3660_p7 = scmp.lt.s32.totalorder %s195_s22, %s195_s22 }
  0x66   :  { %p3656_p6 = scmp.ne.s32.totalorder %s195_s22, %s3655_s14  ;;  %p3661_p8 = scmp.lt.s32.totalorder %s3655_s14, %s3655_s14 }
  0x68   :  { %p3662_p9 = por %p3661_p8, %p3660_p7 }
  0x6a   :  { %p3663_p10 = pnand %p3662_p9, %p3656_p6 }
  0x6c   :  { %3666 = shalt.err (!%p3663_p10)
}
  0x6d   :  { %s4047_s30 = smov 128   ;;  %s4048_s26 = smov 8  }
  0x6e   :  { %200 = dma.hbm_to_vmem [thread:$0]  %s4168_s4, 384, %s195_s22, [#allocation17], %s4047_s30, %s4047_s30, %s4048_s26  }
  0x6f   :  { %s4049_s0 = smov [#allocation19]   ;;  %s4050_s1 = smov [#allocation22]  }
  0x70   :  { %s217_s28 = sshll.u32 %s4049_s0, 4  ;;  %s239_s20 = sshll.u32 %s4050_s1, 4  ;;  %s218_s28 = int_to_ptr.vmem [resolvable:$true] %s217_s28  ;;  %s240_s20 = int_to_ptr.vmem [resolvable:$true] %s239_s20 }
  0x71   :  { %s3675_s2 = scalar_lea.vmem %s218_s28, 128  ;;  %p3680_p12 = scmp.lt.s32.totalorder %s218_s28, %s218_s28 }
  0x72   :  { %p3676_p11 = scmp.ne.s32.totalorder %s218_s28, %s3675_s2  ;;  %p3681_p13 = scmp.lt.s32.totalorder %s3675_s2, %s3675_s2 }
  0x74   :  { %p3682_p0 = por %p3681_p13, %p3680_p12 }
  0x76   :  { %p3683_p1 = pnand %p3682_p0, %p3676_p11 }
  0x78   :  { %3686 = shalt.err (!%p3683_p1)
}
  0x79   :  { %220 = dma.hbm_to_vmem [thread:$0]  %s4178_s12, 128, %s218_s28, [#allocation20]  }
  0x7a   :  { %s3695_s7 = scalar_lea.vmem %s240_s20, 128  ;;  %p3700_p3 = scmp.lt.s32.totalorder %s240_s20, %s240_s20 }
  0x7b   :  { %p3696_p2 = scmp.ne.s32.totalorder %s240_s20, %s3695_s7  ;;  %p3701_p4 = scmp.lt.s32.totalorder %s3695_s7, %s3695_s7 }
  0x7d   :  { %p3702_p5 = por %p3701_p4, %p3700_p3 }
  0x7f   :  { %p3703_p6 = pnand %p3702_p5, %p3696_p2 }
  0x81   :  { %3706 = shalt.err (!%p3703_p6)
}
  0x82   :  { %242 = dma.hbm_to_vmem [thread:$0]  %s4188_s29, 128, %s240_s20, [#allocation23]  }
  0x83   :  { %s4051_s4 = smov [#allocation25]   ;;  %s4052_s15 = smov [#allocation28]  }
  0x84   :  { %s258_s21 = sshll.u32 %s4051_s4, 4  ;;  %s281_s16 = sshll.u32 %s4052_s15, 4  ;;  %s259_s21 = int_to_ptr.vmem [resolvable:$true] %s258_s21  ;;  %s282_s16 = int_to_ptr.vmem [resolvable:$true] %s281_s16 }
  0x85   :  { %s3715_s18 = scalar_lea.vmem %s259_s21, 384  ;;  %p3720_p8 = scmp.lt.s32.totalorder %s259_s21, %s259_s21 }
  0x86   :  { %p3716_p7 = scmp.ne.s32.totalorder %s259_s21, %s3715_s18  ;;  %p3721_p9 = scmp.lt.s32.totalorder %s3715_s18, %s3715_s18 }
  0x88   :  { %p3722_p10 = por %p3721_p9, %p3720_p8 }
  0x8a   :  { %p3723_p11 = pnand %p3722_p10, %p3716_p7 }
  0x8c   :  { %3726 = shalt.err (!%p3723_p11)
}
  0x8d   :  { %264 = dma.hbm_to_vmem [thread:$0]  %s4198_s13, 384, %s259_s21, [#allocation26], %s4047_s30, %s4047_s30, %s4048_s26  }
  0x8e   :  { %s3735_s12 = scalar_lea.vmem %s282_s16, 128  ;;  %p3740_p13 = scmp.lt.s32.totalorder %s282_s16, %s282_s16 }
  0x8f   :  { %p3736_p12 = scmp.ne.s32.totalorder %s282_s16, %s3735_s12  ;;  %p3741_p0 = scmp.lt.s32.totalorder %s3735_s12, %s3735_s12 }
  0x91   :  { %p3742_p1 = por %p3741_p0, %p3740_p13 }
  0x93   :  { %p3743_p2 = pnand %p3742_p1, %p3736_p12 }
  0x95   :  { %3746 = shalt.err (!%p3743_p2)
}
  0x96   :  { %284 = dma.hbm_to_vmem [thread:$0]  %s4208_s9, 128, %s282_s16, [#allocation29]  }
  0x97   :  { %s4053_s29 = smov [#allocation31]   ;;  %s4054_s23 = smov [#allocation2]  }
  0x98   :  { %s303_s22 = sshll.u32 %s4053_s29, 4  ;;  %s91_s14 = sshll.u32 %s4054_s23, 4  ;;  %s304_s22 = int_to_ptr.vmem [resolvable:$true] %s303_s22  ;;  %s92_s14 = int_to_ptr.vmem [resolvable:$true] %s91_s14 }
  0x99   :  { %s3755_s0 = scalar_lea.vmem %s304_s22, 128  ;;  %p3760_p4 = scmp.lt.s32.totalorder %s304_s22, %s304_s22 }
  0x9a   :  { %p3756_p3 = scmp.ne.s32.totalorder %s304_s22, %s3755_s0  ;;  %p3761_p5 = scmp.lt.s32.totalorder %s3755_s0, %s3755_s0 }
  0x9c   :  { %p3762_p6 = por %p3761_p5, %p3760_p4 }
  0x9e   :  { %p3763_p7 = pnand %p3762_p6, %p3756_p3 }
  0xa0   :  { %3766 = shalt.err (!%p3763_p7)
}
  0xa1   :  { %306 = dma.hbm_to_vmem [thread:$0]  %s4218_s24, 128, %s304_s22, [#allocation32]  }
  0xa2   :  { %s3775_s13 = scalar_lea.vmem %s92_s14, 128  ;;  %p3780_p9 = scmp.lt.s32.totalorder %s92_s14, %s92_s14 }
  0xa3   :  { %p3776_p8 = scmp.ne.s32.totalorder %s92_s14, %s3775_s13  ;;  %p3781_p10 = scmp.lt.s32.totalorder %s3775_s13, %s3775_s13 }
  0xa5   :  { %p3782_p11 = por %p3781_p10, %p3780_p9 }
  0xa7   :  { %p3783_p12 = pnand %p3782_p11, %p3776_p8 }
  0xa9   :  { %3786 = shalt.err (!%p3783_p12)
}
  0xaa   :  { %94 = dma.hbm_to_vmem [thread:$0]  %s4098_s17, 128, %s92_s14, [#allocation3]  }
  0xab   :  { %s4055_s9 = smov [#allocation6]   ;;  %s4056_s1 = smov [#allocation9]  }
  0xac   :  { %s116_s28 = sshll.u32 %s4055_s9, 4  ;;  %s141_s20 = sshll.u32 %s4056_s1, 4  ;;  %s117_s28 = int_to_ptr.vmem [resolvable:$true] %s116_s28  ;;  %s142_s20 = int_to_ptr.vmem [resolvable:$true] %s141_s20 }
  0xad   :  { %s3795_s2 = scalar_lea.vmem %s117_s28, 144  ;;  %s3799_s7 = scalar_lea.vmem %s117_s28, 160 }
  0xae   :  { %p3796_p13 = scmp.ne.s32.totalorder %s117_s28, %s3795_s2  ;;  %p3800_p0 = scmp.lt.s32.totalorder %s117_s28, %s117_s28 }
  0xaf   :  { %p3801_p1 = scmp.lt.s32.totalorder %s3799_s7, %s3795_s2 }
  0xb1   :  { %p3802_p2 = por %p3801_p1, %p3800_p0 }
  0xb3   :  { %p3803_p3 = pnand %p3802_p2, %p3796_p13 }
  0xb5   :  { %3806 = shalt.err (!%p3803_p3)
}
  0xb6   :  { %122 = dma.hbm_to_vmem [thread:$0]  %s4123_s8, 144, %s117_s28, [#allocation5], %s4043_s10, %s4043_s10, %s4044_s11  }
  0xb7   :  { %s3815_s17 = scalar_lea.vmem %s142_s20, 128  ;;  %p3820_p5 = scmp.lt.s32.totalorder %s142_s20, %s142_s20 }
  0xb8   :  { %p3816_p4 = scmp.ne.s32.totalorder %s142_s20, %s3815_s17  ;;  %p3821_p6 = scmp.lt.s32.totalorder %s3815_s17, %s3815_s17 }
  0xba   :  { %p3822_p7 = por %p3821_p6, %p3820_p5 }
  0xbc   :  { %p3823_p8 = pnand %p3822_p7, %p3816_p4 }
  0xbe   :  { %3826 = shalt.err (!%p3823_p8)
}
  0xbf   :  { %144 = dma.hbm_to_vmem [thread:$0]  %s4133_s19, 128, %s142_s20, [#allocation8]  }
  0xc0   :  { %s4057_s24 = smov [#allocation12]   ;;  %s4058_s21 = smov [#allocation15]  }
  0xc1   :  { %s163_s4 = sshll.u32 %s4057_s24, 4  ;;  %s185_s15 = sshll.u32 %s4058_s21, 4  ;;  %s164_s4 = int_to_ptr.vmem [resolvable:$true] %s163_s4  ;;  %s186_s15 = int_to_ptr.vmem [resolvable:$true] %s185_s15 }
  0xc2   :  { %s3835_s16 = scalar_lea.vmem %s164_s4, 128  ;;  %p3840_p10 = scmp.lt.s32.totalorder %s164_s4, %s164_s4 }
  0xc3   :  { %p3836_p9 = scmp.ne.s32.totalorder %s164_s4, %s3835_s16  ;;  %p3841_p11 = scmp.lt.s32.totalorder %s3835_s16, %s3835_s16 }
  0xc5   :  { %p3842_p12 = por %p3841_p11, %p3840_p10 }
  0xc7   :  { %p3843_p13 = pnand %p3842_p12, %p3836_p9 }
  0xc9   :  { %3846 = shalt.err (!%p3843_p13)
}
  0xca   :  { %166 = dma.hbm_to_vmem [thread:$0]  %s4148_s6, 128, %s164_s4, [#allocation11]  }
  0xcb   :  { %s3855_s8 = scalar_lea.vmem %s186_s15, 128  ;;  %p3860_p1 = scmp.lt.s32.totalorder %s186_s15, %s186_s15 }
  0xcc   :  { %p3856_p0 = scmp.ne.s32.totalorder %s186_s15, %s3855_s8  ;;  %p3861_p2 = scmp.lt.s32.totalorder %s3855_s8, %s3855_s8 }
  0xce   :  { %p3862_p3 = por %p3861_p2, %p3860_p1 }
  0xd0   :  { %p3863_p4 = pnand %p3862_p3, %p3856_p0 }
  0xd2   :  { %3866 = shalt.err (!%p3863_p4)
}
  0xd3   :  { %s4841_s19 = sld [smem:[#allocation53_spill]]  ;;  %s4059_s10 = smov [#allocation18]  }
  0xd4   :  { %s207_s18 = sshll.u32 %s4059_s10, 4  ;;  %s4060_s12 = smov [#allocation21]   ;;  %s208_s18 = int_to_ptr.vmem [resolvable:$true] %s207_s18 }
  0xd5   :  { %s226_s29 = sshll.u32 %s4060_s12, 4  ;;  %s3875_s22 = scalar_lea.vmem %s208_s18, 128  ;;  %s227_s29 = int_to_ptr.vmem [resolvable:$true] %s226_s29 }
  0xd6   :  { %p3876_p5 = scmp.ne.s32.totalorder %s208_s18, %s3875_s22  ;;  %p3880_p6 = scmp.lt.s32.totalorder %s208_s18, %s208_s18 }
  0xd7   :  { %p3881_p7 = scmp.lt.s32.totalorder %s3875_s22, %s3875_s22 }
  0xd9   :  { %188 = dma.hbm_to_vmem [thread:$0]  %s4841_s19, 128, %s186_s15, [#allocation14]  }
  0xda   :  { %p3882_p8 = por %p3881_p7, %p3880_p6 }
  0xdc   :  { %p3883_p9 = pnand %p3882_p8, %p3876_p5 }
  0xde   :  { %3886 = shalt.err (!%p3883_p9)
}
  0xdf   :  { %s4842_s6 = sld [smem:[#allocation54_spill]]  ;;  %s3895_s23 = scalar_lea.vmem %s227_s29, 384 }
  0xe0   :  { %p3896_p10 = scmp.ne.s32.totalorder %s227_s29, %s3895_s23  ;;  %p3900_p11 = scmp.lt.s32.totalorder %s227_s29, %s227_s29 }
  0xe1   :  { %p3901_p12 = scmp.lt.s32.totalorder %s3895_s23, %s3895_s23 }
  0xe3   :  { %p3902_p13 = por %p3901_p12, %p3900_p11 }
  0xe5   :  { %210 = dma.hbm_to_vmem [thread:$0]  %s4842_s6, 128, %s208_s18, [#allocation17]  }
  0xe6   :  { %p3903_p0 = pnand %p3902_p13, %p3896_p10 }
  0xe8   :  { %3906 = shalt.err (!%p3903_p0)
}
  0xe9   :  { %s4843_s14 = sld [smem:[#allocation55_spill]]  ;;  %s4061_s0 = smov [#allocation24]  }
  0xea   :  { %s249_s13 = sshll.u32 %s4061_s0, 4  ;;  %s4062_s9 = smov [#allocation27]   ;;  %s250_s13 = int_to_ptr.vmem [resolvable:$true] %s249_s13 }
  0xeb   :  { %s271_s28 = sshll.u32 %s4062_s9, 4  ;;  %s3915_s1 = scalar_lea.vmem %s250_s13, 128  ;;  %s272_s28 = int_to_ptr.vmem [resolvable:$true] %s271_s28 }
  0xec   :  { %p3916_p1 = scmp.ne.s32.totalorder %s250_s13, %s3915_s1  ;;  %p3920_p2 = scmp.lt.s32.totalorder %s250_s13, %s250_s13 }
  0xed   :  { %p3921_p3 = scmp.lt.s32.totalorder %s3915_s1, %s3915_s1 }
  0xef   :  { %232 = dma.hbm_to_vmem [thread:$0]  %s4843_s14, 384, %s227_s29, [#allocation20], %s4047_s30, %s4047_s30, %s4048_s26  }
  0xf0   :  { %p3922_p4 = por %p3921_p3, %p3920_p2 }
  0xf2   :  { %p3923_p5 = pnand %p3922_p4, %p3916_p1 }
  0xf4   :  { %3926 = shalt.err (!%p3923_p5)
}
  0xf5   :  { %s4844_s20 = sld [smem:[#allocation56_spill]]  ;;  %s3935_s2 = scalar_lea.vmem %s272_s28, 128 }
  0xf6   :  { %p3936_p6 = scmp.ne.s32.totalorder %s272_s28, %s3935_s2  ;;  %p3940_p7 = scmp.lt.s32.totalorder %s272_s28, %s272_s28 }
  0xf7   :  { %p3941_p8 = scmp.lt.s32.totalorder %s3935_s2, %s3935_s2 }
  0xf9   :  { %p3942_p9 = por %p3941_p8, %p3940_p7 }
  0xfb   :  { %252 = dma.hbm_to_vmem [thread:$0]  %s4844_s20, 128, %s250_s13, [#allocation23]  }
  0xfc   :  { %p3943_p10 = pnand %p3942_p9, %p3936_p6 }
  0xfe   :  { %3946 = shalt.err (!%p3943_p10)
}
  0xff   :  { %s4845_s7 = sld [smem:[#allocation57_spill]]  ;;  %s4063_s17 = smov [#allocation30]  }
 0x100   :  { %s290_s24 = sshll.u32 %s4063_s17, 4  ;;  %s4064_s4 = smov [#allocation33]   ;;  %s291_s24 = int_to_ptr.vmem [resolvable:$true] %s290_s24 }
 0x101   :  { %s315_s21 = sshll.u32 %s4064_s4, 4  ;;  %s3955_s15 = scalar_lea.vmem %s291_s24, 384  ;;  %s316_s21 = int_to_ptr.vmem [resolvable:$true] %s315_s21 }
 0x102   :  { %p3956_p11 = scmp.ne.s32.totalorder %s291_s24, %s3955_s15  ;;  %p3960_p12 = scmp.lt.s32.totalorder %s291_s24, %s291_s24 }
 0x103   :  { %p3961_p13 = scmp.lt.s32.totalorder %s3955_s15, %s3955_s15 }
 0x105   :  { %274 = dma.hbm_to_vmem [thread:$0]  %s4845_s7, 128, %s272_s28, [#allocation26]  }
 0x106   :  { %p3962_p0 = por %p3961_p13, %p3960_p12 }
 0x108   :  { %p3963_p1 = pnand %p3962_p0, %p3956_p11 }
 0x10a   :  { %3966 = shalt.err (!%p3963_p1)
}
 0x10b   :  { %s4846_s16 = sld [smem:[#allocation58_spill]]  ;;  %s3975_s8 = scalar_lea.vmem %s316_s21, 64 }
 0x10c   :  { %p3976_p2 = scmp.ne.s32.totalorder %s316_s21, %s3975_s8  ;;  %p3980_p3 = scmp.lt.s32.totalorder %s316_s21, %s316_s21 }
 0x10d   :  { %p3981_p4 = scmp.lt.s32.totalorder %s3975_s8, %s3975_s8 }
 0x10f   :  { %p3982_p5 = por %p3981_p4, %p3980_p3 }
 0x111   :  { %296 = dma.hbm_to_vmem [thread:$0]  %s4846_s16, 384, %s291_s24, [#allocation29], %s4047_s30, %s4047_s30, %s4048_s26  }
 0x112   :  { %p3983_p6 = pnand %p3982_p5, %p3976_p2 }
 0x114   :  { %3986 = shalt.err (!%p3983_p6)
}
 0x115   :  { %318 = dma.hbm_to_vmem [thread:$0]  %s4228_s3, 64, %s316_s21, [#allocation32]  }
 0x116   :  { %3987 = dma.done.wait [#allocation3], 128  }
 0x117   :  { %3988 = vsyncadd [#allocation3], 4294967168 }
 0x118   :  { %3989 = dma.done.wait [#allocation5], 272  }
 0x119   :  { %3990 = vsyncadd [#allocation5], 4294967024 }
 0x11a   :  { %3991 = dma.done.wait [#allocation8], 160  }
 0x11b   :  { %3992 = vsyncadd [#allocation8], 4294967136 }
 0x11c   :  { %3993 = dma.done.wait [#allocation11], 256  }
 0x11d   :  { %3994 = vsyncadd [#allocation11], 4294967040 }
 0x11e   :  { %3995 = dma.done.wait [#allocation14], 256  }
 0x11f   :  { %3996 = vsyncadd [#allocation14], 4294967040 }
 0x120   :  { %3997 = dma.done.wait [#allocation17], 512  }
 0x121   :  { %3998 = vsyncadd [#allocation17], 4294966784 }
 0x122   :  { %3999 = dma.done.wait [#allocation20], 512  }
 0x123   :  { %4000 = vsyncadd [#allocation20], 4294966784 }
 0x124   :  { %4001 = dma.done.wait [#allocation23], 256  }
 0x125   :  { %4002 = vsyncadd [#allocation23], 4294967040 }
 0x126   :  { %4003 = dma.done.wait [#allocation26], 512  }
 0x127   :  { %4004 = vsyncadd [#allocation26], 4294966784 }
 0x128   :  { %4005 = dma.done.wait [#allocation29], 512  }
 0x129   :  { %4006 = vsyncadd [#allocation29], 4294966784 }
 0x12a   :  { %4007 = dma.done.wait [#allocation32], 192  }
 0x12b   :  { %4008 = vsyncadd [#allocation32], 4294967104  ;;  %s4847_s3 = sld [smem:[#allocation46_spill]]  ;;  %v4065_v0 = vmov 0.0   ;;  %vm4066_vm0 = vmmov 0   ;;  %vm411_vm1 = vcmask 1041408  }
 0x12c   :  { %s4848_s30 = sld [smem:[#allocation45_spill]]  ;;  %3129 = vmatprep.subr.mxu0 %v4065_v0  ;;  %3136 = vmatprep.subr.mxu1 %v4065_v0  ;;  %vm489_vm2 = vcmask 1045504   ;;  %vm485_vm3 = vcmask 48128   ;;  %v402_v3 = vld [vmem:[#allocation2] sm:$0xff]  ;;  %v404_v5 = vld [vmem:[#allocation4] sm:$0xff]  ;;  %vm407_vm4 = vcmask 80896  }
 0x12d   :  { %s4849_s26 = sld [smem:[#allocation47_spill]]  ;;  %3138 = vmatprep.mubr.msk.f32.mxu1 %vm4066_vm0, %v4065_v0  ;;  %3133 = vmatprep.mubr.msk.f32.mxu0 %vm4066_vm0, %v4065_v0  ;;  %vm569_vm5 = vcmask 1043456   ;;  %vm565_vm6 = vcmask 31744   ;;  %vm644_vm7 = vcmask 15360   ;;  %v722_v18 = vld [vmem:[#allocation9] sm:$0xff]  ;;  %vm723_vm8 = vcmask 64512  }
 0x12e   :  { %s4850_s19 = sld [smem:[#allocation48_spill]]  ;;  %s4067_s18 = smov 126   ;;  %v4325_v22 = vld [vmem:[#allocation6 + $0x8] ss:$0 sm:$0xff]  ;;  %v4328_v26 = vld [vmem:[#allocation6 + $0x7] ss:$0 sm:$0xff] }
 0x12f   :  { %s4851_s10 = sld [smem:[#allocation49_spill]]  ;;  %s4068_s12 = smov 124   ;;  %v4330_v27 = vld [vmem:[#allocation6 + $0x6] ss:$0 sm:$0xff]  ;;  %v4334_v31 = vld [vmem:[#allocation6 + $0x5] ss:$0 sm:$0xff] }
 0x130   :  { %s4069_s29 = smov 127   ;;  %s4070_s22 = smov 125   ;;  %v4339_v36 = vld [vmem:[#allocation6 + $0x3] ss:$0 sm:$0xff]  ;;  %v4342_v37 = vld [vmem:[#allocation6 + $0x2] ss:$0 sm:$0xff] }
 0x131   :  { %v406_v1 = vld [vmem:[%s4847_s3 + $0x8] sm:$0x3]  ;;  %v405_v4 = vld [vmem:[%s4847_s3] sm:$0xff]  ;;  %s4071_s6 = smov 2   ;;  %s4072_s23 = smov 4   ;;  %vm872_vm9 = vcmask 588800  }
 0x132   :  { %v403_v2 = vld [vmem:[%s4848_s30] sm:$0x3f]  ;;  %3130 = vmatpush3.msk.msra.mxu0 %vm411_vm1, %v406_v1  ;;  %s4073_s14 = smov 3   ;;  %v4346_v41 = vld [vmem:[#allocation6 + $0x1] ss:$0 sm:$0xff]  ;;  %s4852_s0 = sld [smem:[#allocation51_spill]] }
 0x133   :  { %3137 = vmatpush3.msk.msra.mxu1 %vm489_vm2, %v403_v2  ;;  %v564_v6 = vld [vmem:[%s4849_s26] sm:$0xf]  ;;  %3131 = vmatprep.subr.mxu0 %v4065_v0  ;;  %v4349_v42 = vld [vmem:[#allocation7] ss:$0 sm:$0xff]  ;;  %v4352_v44 = vld [vmem:[#allocation6] ss:$0 sm:$0xff] }
 0x134   :  { %3139 = vmatmul.mubr.msk.f32.vlgmr.msra.gmra.mxu1 %vm485_vm3, %v402_v3  ;;  %3132 = vmatpush3.msra.mxu0 %v405_v4  ;;  %v563_v7 = vld [vmem:[%s4850_s19] sm:$0xff]  ;;  %v4354_v46 = vld [vmem:[#allocation7 + $0x1] ss:$0 sm:$0xff]  ;;  %vm1061_vm10 = vcmask 261120   ;;  %s4853_s13 = sld [smem:[#allocation52_spill]]  ;;  %vm2863_vm11 = vcmask 11264  }
 0x135   :  { %3141 = vmatprep.subr.mxu1 %v4065_v0  ;;  %3134 = vmatmul.mubr.msk.f32.vlgmr.msra.gmra.mxu0 %vm407_vm4, %v404_v5  ;;  %v643_v8 = vld [vmem:[%s4851_s10] sm:$0x3]  ;;  %v982_v55 = vld [vmem:[#allocation10] sm:$0xff] }
 0x136   :  { %3142 = vmatpush3.msk.msra.mxu1 %vm569_vm5, %v564_v6  ;;  %3143 = vmatprep.mubr.msk.f32.mxu1 %vm4066_vm0, %v4065_v0 }
 0x137   :  { %3146 = vmatprep.subr.mxu0 %v4065_v0  ;;  %3148 = vmatprep.mubr.msk.f32.mxu0 %vm4066_vm0, %v4065_v0 }
 0x138   :  { %3144 = vmatmul.mubr.msk.f32.vlgmr.msra.gmra.mxu1 %vm565_vm6, %v563_v7  ;;  %3151 = vmatprep.subr.mxu1 %v4065_v0  ;;  %v869_v53 = vld [vmem:[%s4852_s0] sm:$0xff]  ;;  %v870_v56 = vld [vmem:[%s4852_s0 + $0x8] sm:$0xff]  ;;  %v871_v57 = vld [vmem:[%s4852_s0 + $0x10] sm:$0xff] }
 0x139   :  { %3153 = vmatprep.mubr.msk.f32.mxu1 %vm4066_vm0, %v4065_v0  ;;  %3147 = vmatpush3.msk.msra.mxu0 %vm411_vm1, %v643_v8  ;;  %v1060_v7 = vld [vmem:[#allocation12] sm:$0xff] }
 0x13a   :  { %3156 = vmatprep.subr.mxu0 %v4065_v0 }
 0x1f4   :  { %v559_v9 = vpop.f32.mrf.mxu1 }
 0x1f5   :  { %v481_v10 = vpop.f32.mrf.mxu0 }
 0x1f6   :  { %v3140_v11 = vpop.f32.mrf.mxu1  ;;  %v560_v12 = vadd.f32 %v559_v9, %v481_v10 }
 0x1f7   :  { %v3135_v14 = vpop.f32.mrf.mxu0 }
 0x1f8   :  { %v639_v13 = vpop.f32.mrf.mxu1 }
 0x1f9   :  { %3149 = vmatmul.mubr.msk.f32.vlgmr.msra.gmra.mxu0 %vm644_vm7, %v639_v13 }
 0x1fa   :  { %v3145_v15 = vpop.f32.mrf.mxu1  ;;  %3174 = vmatprep.mubr.msk.f32.mxu0 %vm4066_vm0, %v4065_v0 }
 0x2b9   :  { %v717_v16 = vpop.f32.mrf.mxu0 }
 0x2ba   :  { %v4306_v17 = vadd.f32 %v717_v16, %v560_v12 }
 0x2bb   :  { %v3150_v19 = vpop.f32.mrf.mxu0 }
 0x2bc   :  { %3152 = vmatpush3.msra.mxu1 %v4306_v17 }
 0x2bd   :  { %3154 = vmatmul.mubr.msk.f32.vlgmr.msra.gmra.mxu1 %vm723_vm8, %v722_v18  ;;  %3183 = vmatprep.subr.mxu1 %v4065_v0 }
 0x2be   :  { %3185 = vmatprep.mubr.msk.f32.mxu1 %vm4066_vm0, %v4065_v0 }
 0x37d   :  { %v793_v20 = vpop.f32.mrf.mxu1 }
 0x37e   :  { %842 = vrot.lane.b32.xlu1 %v793_v20, %s4067_s18  ;;  %860 = vrot.lane.b32.xlu0 %v793_v20, %s4068_s12 }
 0x37f   :  { %v3155_v21 = vpop.f32.mrf.mxu1 }
 0x382   :  { %833 = vrot.lane.b32.xlu1 %v793_v20, %s4069_s29  ;;  %851 = vrot.lane.b32.xlu0 %v793_v20, %s4070_s22 }
 0x386   :  { %815 = vrot.lane.b32.xlu1 %v793_v20, %s4071_s6  ;;  %824 = vrot.lane.b32.xlu0 %v793_v20, %s4044_s11 }
 0x38a   :  { %797 = vrot.lane.b32.xlu1 %v793_v20, %s4072_s23  ;;  %806 = vrot.lane.b32.xlu0 %v793_v20, %s4073_s14 }
 0x38e   :  { %971 = vrot.lane.b32.xlu1 %v4306_v17, %s4069_s29  ;;  %962 = vrot.lane.b32.xlu0 %v4306_v17, %s4044_s11 }
 0x3f0   :  { %v843_v23 = vpop.permute.xlu1 %842  ;;  %v861_v24 = vpop.permute.xlu0 %860 }
 0x3f1   :  { %v868_v25 = vmul.f32 %v4325_v22, %v861_v24  ;;  %v850_v32 = vmul.f32 %v4330_v27, %v843_v23 }
 0x3f3   :  { %3157 = vmatpush3.msra.mxu0 %v868_v25 }
 0x3f4   :  { %v834_v28 = vpop.permute.xlu1 %833  ;;  %v852_v29 = vpop.permute.xlu0 %851  ;;  %3158 = vmatprep.subr.mxu0 %v4065_v0 }
 0x3f5   :  { %v859_v30 = vmul.f32 %v4328_v26, %v852_v29  ;;  %v841_v35 = vmul.f32 %v4334_v31, %v834_v28 }
 0x3f7   :  { %3159 = vmatpush3.msra.mxu0 %v859_v30 }
 0x3f8   :  { %v816_v33 = vpop.permute.xlu1 %815  ;;  %v825_v34 = vpop.permute.xlu0 %824  ;;  %3160 = vmatprep.subr.mxu0 %v4065_v0 }
 0x3f9   :  { %3161 = vmatpush3.msra.mxu0 %v850_v32  ;;  %v832_v40 = vmul.f32 %v4339_v36, %v825_v34  ;;  %v823_v43 = vmul.f32 %v4342_v37, %v816_v33 }
 0x3fa   :  { %3162 = vmatprep.subr.mxu0 %v4065_v0 }
 0x3fb   :  { %3163 = vmatpush3.msra.mxu0 %v841_v35 }
 0x3fc   :  { %v798_v38 = vpop.permute.xlu1 %797  ;;  %v807_v39 = vpop.permute.xlu0 %806  ;;  %3164 = vmatprep.subr.mxu0 %v4065_v0 }
 0x3fd   :  { %3165 = vmatpush3.msra.mxu0 %v793_v20  ;;  %v814_v48 = vmul.f32 %v4346_v41, %v807_v39  ;;  %v805_v50 = vmul.f32 %v4352_v44, %v798_v38 }
 0x3fe   :  { %3166 = vmatprep.subr.mxu0 %v4065_v0 }
 0x3ff   :  { %3167 = vmatpush3.msra.mxu0 %v832_v40 }
 0x400   :  { %v972_v45 = vpop.permute.xlu1 %971  ;;  %v963_v47 = vpop.permute.xlu0 %962  ;;  %3168 = vmatprep.subr.mxu0 %v4065_v0 }
 0x401   :  { %v970_v49 = vadd.f32 %v4349_v42, %v963_v47  ;;  %3169 = vmatpush3.msra.mxu0 %v823_v43  ;;  %v979_v51 = vadd.f32 %v4354_v46, %v972_v45 }
 0x402   :  { %3170 = vmatprep.subr.mxu0 %v4065_v0 }
 0x403   :  { %v980_v52 = vmax.f32 %v970_v49, %v4306_v17  ;;  %3171 = vmatpush3.msra.mxu0 %v814_v48 }
 0x404   :  { %3172 = vmatprep.subr.mxu0 %v4065_v0 }
 0x405   :  { %v981_v54 = vmax.f32 %v980_v52, %v979_v51  ;;  %3173 = vmatpush3.msra.mxu0 %v805_v50 }
 0x406   :  { %3175 = vmatmul.mubr.msk.f32.vlgmr.msra.gmra.mxu0 %vm872_vm9, %v869_v53  ;;  %3226 = vmatprep.subr.mxu0 %v4065_v0  ;;  %v1159_v53 = vld [vmem:[%s4853_s13] sm:$0xff] }
 0x407   :  { %3184 = vmatpush3.msra.mxu1 %v981_v54  ;;  %3177 = vmatprep.mubr.msk.f32.mxu0 %vm4066_vm0, %v4065_v0 }
 0x408   :  { %3186 = vmatmul.mubr.msk.f32.vlgmr.msra.gmra.mxu1 %vm723_vm8, %v982_v55  ;;  %3188 = vmatprep.subr.mxu1 %v4065_v0 }
 0x409   :  { %3196 = vmatprep.mubr.msk.f32.mxu1 %vm4066_vm0, %v4065_v0 }
 0x40a   :  { %3178 = vmatmul.mubr.msk.f32.gmra.mxu0 %vm872_vm9, %v870_v56 }
 0x40b   :  { %3180 = vmatprep.mubr.msk.f32.mxu0 %vm4066_vm0, %v4065_v0 }
 0x40e   :  { %3181 = vmatmul.mubr.msk.f32.gmra.mxu0 %vm872_vm9, %v871_v57 }
 0x40f   :  { %3234 = vmatprep.mubr.msk.f32.mxu0 %vm4066_vm0, %v4065_v0 }
 0x4c6   :  { %v948_v58 = vpop.f32.mrf.mxu0 }
 0x4c7   :  { %v4390_v6 = vmax.f32 %v948_v58, 0.0 }
 0x4c8   :  { %v3176_v59 = vpop.f32.mrf.mxu0  ;;  %v1052_v60 = vpop.f32.mrf.mxu1 }
 0x4c9   :  { %v1059_v61 = vmax.f32 %v1052_v60, 0.0 }
 0x4ca   :  { %v953_v62 = vpop.f32.mrf.mxu0  ;;  %v3187_v63 = vpop.f32.mrf.mxu1 }
 0x4cb   :  { %1269 = vrot.lane.b32.xlu1 %v1059_v61, %s4069_s29  ;;  %1257 = vrot.lane.b32.xlu0 %v1059_v61, %s4044_s11  ;;  %v4383_v2 = vmax.f32 %v953_v62, 0.0  ;;  %v1283_v63 = vld [vmem:[#allocation13] sm:$0xff] }
 0x4cc   :  { %v3179_v1 = vpop.f32.mrf.mxu0  ;;  %3189 = vmatpush3.msra.mxu1 %v1059_v61 }
 0x4cd   :  { %3190 = vmatprep.subr.mxu1 %v4065_v0  ;;  %v1161_v1 = vld [vmem:[%s4853_s13 + $0x10] sm:$0xff] }
 0x4ce   :  { %v958_v3 = vpop.f32.mrf.mxu0 }
 0x4cf   :  { %v1058_v4 = vmax.f32 %v958_v3, 0.0  ;;  %1253 = vrot.lane.b32.xlu1 %v4383_v2, %s4044_s11 }
 0x4d0   :  { %v3182_v5 = vpop.f32.mrf.mxu0 }
 0x4d1   :  { %1255 = vrot.lane.b32.xlu0 %v1058_v4, %s4044_s11  ;;  %3191 = vmatpush3.msra.mxu1 %v1058_v4 }
 0x4d2   :  { %3192 = vmatprep.subr.mxu1 %v4065_v0 }
 0x4d3   :  { %3193 = vmatpush3.msra.mxu1 %v4383_v2 }
 0x4d4   :  { %3194 = vmatprep.subr.mxu1 %v4065_v0 }
 0x4d5   :  { %3195 = vmatpush3.msra.mxu1 %v4390_v6 }
 0x4d6   :  { %3197 = vmatmul.mubr.msk.f32.vlgmr.msra.gmra.mxu1 %vm1061_vm10, %v1060_v7  ;;  %3199 = vmatprep.subr.mxu1 %v4065_v0 }
 0x4d7   :  { %3217 = vmatprep.mubr.msk.f32.mxu1 %vm4066_vm0, %v4065_v0 }
 0x53d   :  { %v1270_v8 = vpop.permute.xlu1 %1269  ;;  %v1258_v9 = vpop.permute.xlu0 %1257 }
 0x53e   :  { %v1274_v10 = vadd.f32 %v4354_v46, %v1270_v8  ;;  %v1262_v11 = vadd.f32 %v4349_v42, %v1258_v9 }
 0x540   :  { %v1278_v12 = vmax.f32 %v1262_v11, %v1059_v61  ;;  %v1160_v61 = vld [vmem:[%s4853_s13 + $0x8] sm:$0xff] }
 0x541   :  { %v1254_v16 = vpop.permute.xlu1 %1253 }
 0x542   :  { %v1282_v13 = vmax.f32 %v1278_v12, %v1274_v10  ;;  %v1260_v49 = vadd.f32 %v4349_v42, %v1254_v16 }
 0x543   :  { %v1256_v18 = vpop.permute.xlu0 %1255 }
 0x544   :  { %3227 = vmatpush3.msra.mxu0 %v1282_v13  ;;  %v1261_v28 = vadd.f32 %v4349_v42, %v1256_v18  ;;  %v1276_v56 = vmax.f32 %v1260_v49, %v4383_v2 }
 0x545   :  { %3228 = vmatprep.subr.mxu0 %v4065_v0 }
 0x546   :  { %v1277_v34 = vmax.f32 %v1261_v28, %v1058_v4 }
 0x596   :  { %v1131_v14 = vpop.f32.mrf.mxu1 }
 0x597   :  { %1153 = vrot.lane.b32.xlu1 %v1131_v14, %s4070_s22  ;;  %1156 = vrot.lane.b32.xlu0 %v1131_v14, %s4068_s12 }
 0x598   :  { %v3198_v15 = vpop.f32.mrf.mxu1 }
 0x59b   :  { %1147 = vrot.lane.b32.xlu1 %v1131_v14, %s4069_s29  ;;  %1150 = vrot.lane.b32.xlu0 %v1131_v14, %s4067_s18 }
 0x59f   :  { %1141 = vrot.lane.b32.xlu1 %v1131_v14, %s4071_s6  ;;  %1267 = vrot.lane.b32.xlu0 %v1058_v4, %s4069_s29 }
 0x5a3   :  { %1138 = vrot.lane.b32.xlu1 %v1131_v14, %s4073_s14  ;;  %1144 = vrot.lane.b32.xlu0 %v1131_v14, %s4044_s11 }
 0x5a7   :  { %1251 = vrot.lane.b32.xlu1 %v4390_v6, %s4044_s11  ;;  %1135 = vrot.lane.b32.xlu0 %v1131_v14, %s4072_s23 }
 0x5ab   :  { %1263 = vrot.lane.b32.xlu1 %v4390_v6, %s4069_s29  ;;  %1265 = vrot.lane.b32.xlu0 %v4383_v2, %s4069_s29 }
 0x609   :  { %v1154_v19 = vpop.permute.xlu1 %1153  ;;  %v1157_v20 = vpop.permute.xlu0 %1156 }
 0x60a   :  { %v1158_v21 = vmul.f32 %v4325_v22, %v1157_v20  ;;  %v1155_v23 = vmul.f32 %v4328_v26, %v1154_v19 }
 0x60c   :  { %3200 = vmatpush3.msra.mxu1 %v1158_v21 }
 0x60d   :  { %v1148_v24 = vpop.permute.xlu1 %1147  ;;  %3201 = vmatprep.subr.mxu1 %v4065_v0  ;;  %v1151_v25 = vpop.permute.xlu0 %1150 }
 0x60e   :  { %v1152_v29 = vmul.f32 %v4330_v27, %v1151_v25  ;;  %3202 = vmatpush3.msra.mxu1 %v1155_v23  ;;  %v1149_v30 = vmul.f32 %v4334_v31, %v1148_v24 }
 0x60f   :  { %3203 = vmatprep.subr.mxu1 %v4065_v0 }
 0x610   :  { %3204 = vmatpush3.msra.mxu1 %v1152_v29 }
 0x611   :  { %v1142_v32 = vpop.permute.xlu1 %1141  ;;  %3205 = vmatprep.subr.mxu1 %v4065_v0  ;;  %v1268_v33 = vpop.permute.xlu0 %1267 }
 0x612   :  { %v1273_v35 = vadd.f32 %v4354_v46, %v1268_v33  ;;  %3206 = vmatpush3.msra.mxu1 %v1149_v30  ;;  %v1143_v45 = vmul.f32 %v4342_v37, %v1142_v32 }
 0x613   :  { %3207 = vmatprep.subr.mxu1 %v4065_v0 }
 0x614   :  { %v1281_v38 = vmax.f32 %v1277_v34, %v1273_v35  ;;  %3208 = vmatpush3.msra.mxu1 %v1131_v14  ;;  %v1361_v14 = vld [vmem:[#allocation15] sm:$0xff] }
 0x615   :  { %v1139_v39 = vpop.permute.xlu1 %1138  ;;  %v1145_v40 = vpop.permute.xlu0 %1144  ;;  %3209 = vmatprep.subr.mxu1 %v4065_v0 }
 0x616   :  { %v1146_v43 = vmul.f32 %v4339_v36, %v1145_v40  ;;  %3229 = vmatpush3.msra.mxu0 %v1281_v38  ;;  %v1140_v50 = vmul.f32 %v4346_v41, %v1139_v39 }
 0x617   :  { %3230 = vmatprep.subr.mxu0 %v4065_v0 }
 0x618   :  { %3210 = vmatpush3.msra.mxu1 %v1146_v43 }
 0x619   :  { %v1252_v47 = vpop.permute.xlu1 %1251  ;;  %3211 = vmatprep.subr.mxu1 %v4065_v0  ;;  %v1136_v48 = vpop.permute.xlu0 %1135 }
 0x61a   :  { %3212 = vmatpush3.msra.mxu1 %v1143_v45  ;;  %v1259_v51 = vadd.f32 %v4349_v42, %v1252_v47  ;;  %v1137_v52 = vmul.f32 %v4352_v44, %v1136_v48 }
 0x61b   :  { %3213 = vmatprep.subr.mxu1 %v4065_v0 }
 0x61c   :  { %3214 = vmatpush3.msra.mxu1 %v1140_v50  ;;  %v1275_v59 = vmax.f32 %v1259_v51, %v4390_v6 }
 0x61d   :  { %v1264_v54 = vpop.permute.xlu1 %1263  ;;  %3215 = vmatprep.subr.mxu1 %v4065_v0  ;;  %v1266_v55 = vpop.permute.xlu0 %1265 }
 0x61e   :  { %v1271_v57 = vadd.f32 %v4354_v46, %v1264_v54  ;;  %v1272_v58 = vadd.f32 %v4354_v46, %v1266_v55  ;;  %3216 = vmatpush3.msra.mxu1 %v1137_v52 }
 0x61f   :  { %3218 = vmatmul.mubr.msk.f32.vlgmr.msra.gmra.mxu1 %vm872_vm9, %v1159_v53  ;;  %3248 = vmatprep.subr.mxu1 %v4065_v0 }
 0x620   :  { %v1280_v60 = vmax.f32 %v1276_v56, %v1272_v58  ;;  %3220 = vmatprep.mubr.msk.f32.mxu1 %vm4066_vm0, %v4065_v0  ;;  %v1279_v62 = vmax.f32 %v1275_v59, %v1271_v57 }
 0x622   :  { %3231 = vmatpush3.msra.mxu0 %v1280_v60 }
 0x623   :  { %3221 = vmatmul.mubr.msk.f32.gmra.mxu1 %vm872_vm9, %v1160_v61  ;;  %3232 = vmatprep.subr.mxu0 %v4065_v0 }
 0x624   :  { %3233 = vmatpush3.msra.mxu0 %v1279_v62  ;;  %3223 = vmatprep.mubr.msk.f32.mxu1 %vm4066_vm0, %v4065_v0 }
 0x625   :  { %3235 = vmatmul.mubr.msk.f32.vlgmr.msra.gmra.mxu0 %vm1061_vm10, %v1283_v63  ;;  %3237 = vmatprep.subr.mxu0 %v4065_v0 }
 0x626   :  { %3245 = vmatprep.mubr.msk.f32.mxu0 %vm4066_vm0, %v4065_v0 }
 0x627   :  { %3224 = vmatmul.mubr.msk.f32.gmra.mxu1 %vm872_vm9, %v1161_v1 }
 0x628   :  { %3266 = vmatprep.mubr.msk.f32.mxu1 %vm4066_vm0, %v4065_v0 }
 0x6df   :  { %v1237_v2 = vpop.f32.mrf.mxu1 }
 0x6e0   :  { %v4460_v3 = vmax.f32 %v1237_v2, 0.0 }
 0x6e1   :  { %v3219_v4 = vpop.f32.mrf.mxu1 }
 0x6e2   :  { %1551 = vrot.lane.b32.xlu1 %v4460_v3, %s4044_s11 }
 0x6e3   :  { %v1242_v5 = vpop.f32.mrf.mxu1 }
 0x6e4   :  { %v4466_v13 = vmax.f32 %v1242_v5, 0.0  ;;  %v1459_v5 = vld [vmem:[#allocation16] sm:$0xff] }
 0x6e5   :  { %v3222_v6 = vpop.f32.mrf.mxu1  ;;  %v1353_v7 = vpop.f32.mrf.mxu0 }
 0x6e6   :  { %v1360_v8 = vmax.f32 %v1353_v7, 0.0  ;;  %v1583_v7 = vld [vmem:[#allocation18] sm:$0xff] }
 0x6e7   :  { %v1247_v9 = vpop.f32.mrf.mxu1  ;;  %v3236_v10 = vpop.f32.mrf.mxu0 }
 0x6e8   :  { %v1359_v11 = vmax.f32 %v1247_v9, 0.0  ;;  %1557 = vrot.lane.b32.xlu0 %v1360_v8, %s4044_s11  ;;  %3238 = vmatpush3.msra.mxu0 %v1360_v8  ;;  %v1662_v9 = vld [vmem:[%s4223_s5 + $0x8] sm:$0xff]  ;;  %v1663_v10 = vld [vmem:[%s4223_s5 + $0x10] sm:$0xff] }
 0x6e9   :  { %v3225_v12 = vpop.f32.mrf.mxu1  ;;  %3239 = vmatprep.subr.mxu0 %v4065_v0 }
 0x6ea   :  { %1555 = vrot.lane.b32.xlu1 %v1359_v11, %s4044_s11  ;;  %3240 = vmatpush3.msra.mxu0 %v1359_v11  ;;  %v1664_v12 = vld [vmem:[%s4223_s5 + $0x18] sm:$0xff] }
 0x6eb   :  { %3241 = vmatprep.subr.mxu0 %v4065_v0 }
 0x6ec   :  { %1569 = vrot.lane.b32.xlu0 %v1360_v8, %s4069_s29  ;;  %3242 = vmatpush3.msra.mxu0 %v4466_v13 }
 0x6ed   :  { %3243 = vmatprep.subr.mxu0 %v4065_v0 }
 0x6ee   :  { %1567 = vrot.lane.b32.xlu1 %v1359_v11, %s4069_s29  ;;  %3244 = vmatpush3.msra.mxu0 %v4460_v3 }
 0x6ef   :  { %3246 = vmatmul.mubr.msk.f32.vlgmr.msra.gmra.mxu0 %vm1061_vm10, %v1361_v14  ;;  %3275 = vmatprep.subr.mxu0 %v4065_v0 }
 0x6f0   :  { %1553 = vrot.lane.b32.xlu0 %v4466_v13, %s4044_s11  ;;  %3283 = vmatprep.mubr.msk.f32.mxu0 %vm4066_vm0, %v4065_v0 }
 0x754   :  { %v1552_v15 = vpop.permute.xlu1 %1551 }
 0x755   :  { %v1559_v59 = vadd.f32 %v4349_v42, %v1552_v15 }
 0x757   :  { %v1575_v1 = vmax.f32 %v1559_v59, %v4460_v3 }
 0x75a   :  { %v1558_v16 = vpop.permute.xlu0 %1557 }
 0x75b   :  { %v1562_v18 = vadd.f32 %v4349_v42, %v1558_v16 }
 0x75c   :  { %v1556_v19 = vpop.permute.xlu1 %1555 }
 0x75d   :  { %v1561_v20 = vadd.f32 %v4349_v42, %v1556_v19  ;;  %v1578_v23 = vmax.f32 %v1562_v18, %v1360_v8  ;;  %v1661_v8 = vld [vmem:[%s4223_s5] sm:$0xff]  ;;  %s4854_s5 = sld [smem:[#allocation50_spill]] }
 0x75e   :  { %v1570_v21 = vpop.permute.xlu0 %1569 }
 0x75f   :  { %v1574_v24 = vadd.f32 %v4354_v46, %v1570_v21  ;;  %v1577_v28 = vmax.f32 %v1561_v20, %v1359_v11  ;;  %v1461_v11 = vld [vmem:[#allocation16 + $0x10] sm:$0xff] }
 0x760   :  { %v1568_v25 = vpop.permute.xlu1 %1567 }
 0x761   :  { %v1582_v29 = vmax.f32 %v1578_v23, %v1574_v24  ;;  %v1573_v30 = vadd.f32 %v4354_v46, %v1568_v25 }
 0x762   :  { %v1554_v35 = vpop.permute.xlu0 %1553 }
 0x763   :  { %v1581_v32 = vmax.f32 %v1577_v28, %v1573_v30  ;;  %3276 = vmatpush3.msra.mxu0 %v1582_v29  ;;  %v1560_v48 = vadd.f32 %v4349_v42, %v1554_v35 }
 0x764   :  { %3277 = vmatprep.subr.mxu0 %v4065_v0 }
 0x765   :  { %3278 = vmatpush3.msra.mxu0 %v1581_v32  ;;  %v1576_v53 = vmax.f32 %v1560_v48, %v4466_v13 }
 0x766   :  { %3279 = vmatprep.subr.mxu0 %v4065_v0 }
 0x7af   :  { %v1431_v33 = vpop.f32.mrf.mxu0 }
 0x7b0   :  { %1453 = vrot.lane.b32.xlu1 %v1431_v33, %s4070_s22  ;;  %1456 = vrot.lane.b32.xlu0 %v1431_v33, %s4068_s12 }
 0x7b1   :  { %v3247_v34 = vpop.f32.mrf.mxu0 }
 0x7b4   :  { %1447 = vrot.lane.b32.xlu1 %v1431_v33, %s4069_s29  ;;  %1450 = vrot.lane.b32.xlu0 %v1431_v33, %s4067_s18 }
 0x7b8   :  { %1444 = vrot.lane.b32.xlu1 %v1431_v33, %s4044_s11  ;;  %1565 = vrot.lane.b32.xlu0 %v4466_v13, %s4069_s29 }
 0x7bc   :  { %1438 = vrot.lane.b32.xlu1 %v1431_v33, %s4073_s14  ;;  %1441 = vrot.lane.b32.xlu0 %v1431_v33, %s4071_s6 }
 0x7c0   :  { %1435 = vrot.lane.b32.xlu1 %v1431_v33, %s4072_s23  ;;  %1563 = vrot.lane.b32.xlu0 %v4460_v3, %s4069_s29  ;;  %v1460_v3 = vld [vmem:[#allocation16 + $0x8] sm:$0xff] }
 0x822   :  { %v1454_v38 = vpop.permute.xlu1 %1453  ;;  %v1457_v39 = vpop.permute.xlu0 %1456 }
 0x823   :  { %v1458_v40 = vmul.f32 %v4325_v22, %v1457_v39  ;;  %v1455_v43 = vmul.f32 %v4328_v26, %v1454_v38 }
 0x825   :  { %3249 = vmatpush3.msra.mxu1 %v1458_v40 }
 0x826   :  { %v1448_v45 = vpop.permute.xlu1 %1447  ;;  %3250 = vmatprep.subr.mxu1 %v4065_v0  ;;  %v1451_v47 = vpop.permute.xlu0 %1450 }
 0x827   :  { %v1452_v49 = vmul.f32 %v4330_v27, %v1451_v47  ;;  %3251 = vmatpush3.msra.mxu1 %v1455_v43  ;;  %v1449_v50 = vmul.f32 %v4334_v31, %v1448_v45  ;;  %v1770_v47 = vld [vmem:[#allocation19] sm:$0xff] }
 0x828   :  { %3252 = vmatprep.subr.mxu1 %v4065_v0 }
 0x829   :  { %3253 = vmatpush3.msra.mxu1 %v1452_v49 }
 0x82a   :  { %v1445_v51 = vpop.permute.xlu1 %1444  ;;  %3254 = vmatprep.subr.mxu1 %v4065_v0  ;;  %v1566_v52 = vpop.permute.xlu0 %1565 }
 0x82b   :  { %v1572_v54 = vadd.f32 %v4354_v46, %v1566_v52  ;;  %3255 = vmatpush3.msra.mxu1 %v1449_v50  ;;  %v1446_v55 = vmul.f32 %v4339_v36, %v1445_v51 }
 0x82c   :  { %3256 = vmatprep.subr.mxu1 %v4065_v0 }
 0x82d   :  { %v1580_v56 = vmax.f32 %v1576_v53, %v1572_v54  ;;  %3257 = vmatpush3.msra.mxu1 %v1431_v33 }
 0x82e   :  { %v1439_v57 = vpop.permute.xlu1 %1438  ;;  %3258 = vmatprep.subr.mxu1 %v4065_v0  ;;  %v1442_v58 = vpop.permute.xlu0 %1441 }
 0x82f   :  { %v1443_v60 = vmul.f32 %v4342_v37, %v1442_v58  ;;  %3259 = vmatpush3.msra.mxu1 %v1446_v55  ;;  %3280 = vmatpush3.msra.mxu0 %v1580_v56  ;;  %v1440_v61 = vmul.f32 %v4346_v41, %v1439_v57 }
 0x830   :  { %3260 = vmatprep.subr.mxu1 %v4065_v0  ;;  %3281 = vmatprep.subr.mxu0 %v4065_v0 }
 0x831   :  { %3261 = vmatpush3.msra.mxu1 %v1443_v60 }
 0x832   :  { %v1436_v62 = vpop.permute.xlu1 %1435  ;;  %3262 = vmatprep.subr.mxu1 %v4065_v0  ;;  %v1564_v63 = vpop.permute.xlu0 %1563 }
 0x833   :  { %v1437_v2 = vmul.f32 %v4352_v44, %v1436_v62  ;;  %v1571_v4 = vadd.f32 %v4354_v46, %v1564_v63  ;;  %3263 = vmatpush3.msra.mxu1 %v1440_v61 }
 0x834   :  { %3264 = vmatprep.subr.mxu1 %v4065_v0 }
 0x835   :  { %v1579_v6 = vmax.f32 %v1575_v1, %v1571_v4  ;;  %3265 = vmatpush3.msra.mxu1 %v1437_v2 }
 0x836   :  { %3267 = vmatmul.mubr.msk.f32.vlgmr.msra.gmra.mxu1 %vm872_vm9, %v1459_v5  ;;  %3305 = vmatprep.subr.mxu1 %v4065_v0 }
 0x837   :  { %3282 = vmatpush3.msra.mxu0 %v1579_v6  ;;  %3269 = vmatprep.mubr.msk.f32.mxu1 %vm4066_vm0, %v4065_v0 }
 0x838   :  { %3284 = vmatmul.mubr.msk.f32.vlgmr.msra.gmra.mxu0 %vm1061_vm10, %v1583_v7  ;;  %3286 = vmatprep.subr.mxu0 %v4306_v17 }
 0x839   :  { %3287 = vmatpush3.msra.mxu0 %v4306_v17  ;;  %3288 = vmatprep.mubr.msk.f32.mxu0 %vm723_vm8, %v1661_v8 }
 0x83a   :  { %3270 = vmatmul.mubr.msk.f32.gmra.mxu1 %vm872_vm9, %v1460_v3  ;;  %3294 = vmatprep.subr.mxu0 %v4065_v0 }
 0x83b   :  { %3272 = vmatprep.mubr.msk.f32.mxu1 %vm4066_vm0, %v4065_v0 }
 0x83c   :  { %3289 = vmatmul.mubr.msk.f32.vlgmr.msra.gmra.mxu0 %vm723_vm8, %v1662_v9 }
 0x83d   :  { %3291 = vmatprep.mubr.msk.f32.mxu0 %vm723_vm8, %v1663_v10 }
 0x83e   :  { %3273 = vmatmul.mubr.msk.f32.gmra.mxu1 %vm872_vm9, %v1461_v11 }
 0x83f   :  { %3323 = vmatprep.mubr.msk.f32.mxu1 %vm4066_vm0, %v4065_v0 }
 0x840   :  { %3292 = vmatmul.mubr.msk.f32.gmra.mxu0 %vm723_vm8, %v1664_v12 }
 0x841   :  { %3302 = vmatprep.mubr.msk.f32.mxu0 %vm4066_vm0, %v4065_v0 }
 0x8f6   :  { %v1537_v17 = vpop.f32.mrf.mxu1 }
 0x8f7   :  { %v1657_v38 = vmax.f32 %v1537_v17, 0.0 }
 0x8f8   :  { %v3268_v13 = vpop.f32.mrf.mxu1  ;;  %v1653_v14 = vpop.f32.mrf.mxu0 }
 0x8f9   :  { %v1660_v23 = vmax.f32 %v1653_v14, 0.0 }
 0x8fa   :  { %v1542_v15 = vpop.f32.mrf.mxu1  ;;  %v3285_v16 = vpop.f32.mrf.mxu0 }
 0x8fb   :  { %v1658_v24 = vmax.f32 %v1542_v15, 0.0 }
 0x8fc   :  { %v3271_v18 = vpop.f32.mrf.mxu1  ;;  %v3290_v19 = vpop.f32.mrf.mxu0 }
 0x8fd   :  { %v1763_v33 = vadd.f32 %v3290_v19, %v1658_v24  ;;  %v1868_v19 = vld [vmem:[#allocation21] sm:$0xff] }
 0x8fe   :  { %v1547_v20 = vpop.f32.mrf.mxu1  ;;  %v1743_v21 = vpop.f32.mrf.mxu0 }
 0x8ff   :  { %v1659_v25 = vmax.f32 %v1547_v20, 0.0  ;;  %v1762_v40 = vadd.f32 %v1743_v21, %v1657_v38  ;;  %v4555_v43 = vmax.f32 %v1763_v33, 0.0  ;;  %v1992_v33 = vld [vmem:[#allocation22] sm:$0xff] }
 0x900   :  { %v3274_v28 = vpop.f32.mrf.mxu1  ;;  %v3293_v29 = vpop.f32.mrf.mxu0 }
 0x901   :  { %v1765_v30 = vadd.f32 %v3293_v29, %v1660_v23  ;;  %v4562_v45 = vmax.f32 %v1762_v40, 0.0 }
 0x902   :  { %v1753_v32 = vpop.f32.mrf.mxu0 }
 0x903   :  { %v4546_v34 = vmax.f32 %v1765_v30, 0.0  ;;  %v1764_v35 = vadd.f32 %v1753_v32, %v1659_v25  ;;  %v1869_v30 = vld [vmem:[#allocation21 + $0x8] sm:$0xff] }
 0x905   :  { %v4548_v39 = vmax.f32 %v1764_v35, 0.0  ;;  %1978 = vrot.lane.b32.xlu1 %v4546_v34, %s4069_s29  ;;  %1966 = vrot.lane.b32.xlu0 %v4546_v34, %s4044_s11  ;;  %v1870_v35 = vld [vmem:[#allocation21 + $0x10] sm:$0xff] }
 0x906   :  { %3295 = vmatpush3.msra.mxu0 %v4546_v34 }
 0x907   :  { %3296 = vmatprep.subr.mxu0 %v4065_v0 }
 0x908   :  { %3297 = vmatpush3.msra.mxu0 %v4548_v39 }
 0x909   :  { %3298 = vmatprep.subr.mxu0 %v4065_v0  ;;  %1962 = vrot.lane.b32.xlu1 %v4555_v43, %s4044_s11 }
 0x90a   :  { %1964 = vrot.lane.b32.xlu0 %v4548_v39, %s4044_s11  ;;  %3299 = vmatpush3.msra.mxu0 %v4555_v43 }
 0x90b   :  { %3300 = vmatprep.subr.mxu0 %v4065_v0 }
 0x90c   :  { %3301 = vmatpush3.msra.mxu0 %v4562_v45 }
 0x90d   :  { %3303 = vmatmul.mubr.msk.f32.vlgmr.msra.gmra.mxu0 %vm1061_vm10, %v1770_v47  ;;  %3332 = vmatprep.subr.mxu0 %v4065_v0 }
 0x90e   :  { %3340 = vmatprep.mubr.msk.f32.mxu0 %vm4066_vm0, %v4065_v0 }
 0x977   :  { %v1979_v48 = vpop.permute.xlu1 %1978  ;;  %v1967_v49 = vpop.permute.xlu0 %1966 }
 0x978   :  { %v1971_v50 = vadd.f32 %v4349_v42, %v1967_v49  ;;  %v1983_v51 = vadd.f32 %v4354_v46, %v1979_v48 }
 0x97a   :  { %v1987_v52 = vmax.f32 %v1971_v50, %v4546_v34 }
 0x97b   :  { %v1963_v56 = vpop.permute.xlu1 %1962 }
 0x97c   :  { %v1991_v53 = vmax.f32 %v1987_v52, %v1983_v51  ;;  %v1965_v57 = vpop.permute.xlu0 %1964  ;;  %v1969_v14 = vadd.f32 %v4349_v42, %v1963_v56 }
 0x97d   :  { %v1970_v1 = vadd.f32 %v4349_v42, %v1965_v57  ;;  %v2070_v57 = vld [vmem:[#allocation24] sm:$0xff] }
 0x97e   :  { %3333 = vmatpush3.msra.mxu0 %v1991_v53  ;;  %v1985_v23 = vmax.f32 %v1969_v14, %v4555_v43 }
 0x97f   :  { %3334 = vmatprep.subr.mxu0 %v4065_v0  ;;  %v1986_v7 = vmax.f32 %v1970_v1, %v4548_v39 }
 0x9cd   :  { %v1840_v54 = vpop.f32.mrf.mxu0 }
 0x9ce   :  { %1862 = vrot.lane.b32.xlu1 %v1840_v54, %s4070_s22  ;;  %1865 = vrot.lane.b32.xlu0 %v1840_v54, %s4068_s12 }
 0x9cf   :  { %v3304_v55 = vpop.f32.mrf.mxu0 }
 0x9d2   :  { %1856 = vrot.lane.b32.xlu1 %v1840_v54, %s4069_s29  ;;  %1859 = vrot.lane.b32.xlu0 %v1840_v54, %s4067_s18 }
 0x9d6   :  { %1850 = vrot.lane.b32.xlu1 %v1840_v54, %s4071_s6  ;;  %1976 = vrot.lane.b32.xlu0 %v4548_v39, %s4069_s29 }
 0x9da   :  { %1847 = vrot.lane.b32.xlu1 %v1840_v54, %s4073_s14  ;;  %1853 = vrot.lane.b32.xlu0 %v1840_v54, %s4044_s11 }
 0x9de   :  { %1960 = vrot.lane.b32.xlu1 %v4562_v45, %s4044_s11  ;;  %1844 = vrot.lane.b32.xlu0 %v1840_v54, %s4072_s23 }
 0x9e2   :  { %1972 = vrot.lane.b32.xlu1 %v4562_v45, %s4069_s29  ;;  %1974 = vrot.lane.b32.xlu0 %v4555_v43, %s4069_s29 }
 0xa40   :  { %v1863_v58 = vpop.permute.xlu1 %1862  ;;  %v1866_v59 = vpop.permute.xlu0 %1865 }
 0xa41   :  { %v1867_v60 = vmul.f32 %v4325_v22, %v1866_v59  ;;  %v1864_v61 = vmul.f32 %v4328_v26, %v1863_v58 }
 0xa43   :  { %3306 = vmatpush3.msra.mxu1 %v1867_v60 }
 0xa44   :  { %v1857_v62 = vpop.permute.xlu1 %1856  ;;  %3307 = vmatprep.subr.mxu1 %v4065_v0  ;;  %v1860_v63 = vpop.permute.xlu0 %1859 }
 0xa45   :  { %v1861_v2 = vmul.f32 %v4330_v27, %v1860_v63  ;;  %3308 = vmatpush3.msra.mxu1 %v1864_v61  ;;  %v1858_v4 = vmul.f32 %v4334_v31, %v1857_v62 }
 0xa46   :  { %3309 = vmatprep.subr.mxu1 %v4065_v0 }
 0xa47   :  { %3310 = vmatpush3.msra.mxu1 %v1861_v2 }
 0xa48   :  { %v1851_v5 = vpop.permute.xlu1 %1850  ;;  %3311 = vmatprep.subr.mxu1 %v4065_v0  ;;  %v1977_v6 = vpop.permute.xlu0 %1976 }
 0xa49   :  { %v1982_v8 = vadd.f32 %v4354_v46, %v1977_v6  ;;  %3312 = vmatpush3.msra.mxu1 %v1858_v4  ;;  %v1852_v12 = vmul.f32 %v4342_v37, %v1851_v5 }
 0xa4a   :  { %3313 = vmatprep.subr.mxu1 %v4065_v0 }
 0xa4b   :  { %v1990_v3 = vmax.f32 %v1986_v7, %v1982_v8  ;;  %3314 = vmatpush3.msra.mxu1 %v1840_v54 }
 0xa4c   :  { %v1848_v9 = vpop.permute.xlu1 %1847  ;;  %v1854_v10 = vpop.permute.xlu0 %1853  ;;  %3315 = vmatprep.subr.mxu1 %v4065_v0 }
 0xa4d   :  { %v1855_v11 = vmul.f32 %v4339_v36, %v1854_v10  ;;  %3335 = vmatpush3.msra.mxu0 %v1990_v3  ;;  %v1849_v15 = vmul.f32 %v4346_v41, %v1848_v9 }
 0xa4e   :  { %3336 = vmatprep.subr.mxu0 %v4065_v0 }
 0xa4f   :  { %3316 = vmatpush3.msra.mxu1 %v1855_v11 }
 0xa50   :  { %v1961_v17 = vpop.permute.xlu1 %1960  ;;  %3317 = vmatprep.subr.mxu1 %v4065_v0  ;;  %v1845_v13 = vpop.permute.xlu0 %1844 }
 0xa51   :  { %3318 = vmatpush3.msra.mxu1 %v1852_v12  ;;  %v1968_v16 = vadd.f32 %v4349_v42, %v1961_v17  ;;  %v1846_v18 = vmul.f32 %v4352_v44, %v1845_v13 }
 0xa52   :  { %3319 = vmatprep.subr.mxu1 %v4065_v0 }
 0xa53   :  { %3320 = vmatpush3.msra.mxu1 %v1849_v15  ;;  %v1984_v28 = vmax.f32 %v1968_v16, %v4562_v45 }
 0xa54   :  { %v1973_v20 = vpop.permute.xlu1 %1972  ;;  %3321 = vmatprep.subr.mxu1 %v4065_v0  ;;  %v1975_v21 = vpop.permute.xlu0 %1974 }
 0xa55   :  { %v1980_v24 = vadd.f32 %v4354_v46, %v1973_v20  ;;  %v1981_v25 = vadd.f32 %v4354_v46, %v1975_v21  ;;  %3322 = vmatpush3.msra.mxu1 %v1846_v18 }
 0xa56   :  { %3324 = vmatmul.mubr.msk.f32.vlgmr.msra.gmra.mxu1 %vm872_vm9, %v1868_v19  ;;  %3354 = vmatprep.subr.mxu1 %v4065_v0 }
 0xa57   :  { %v1989_v29 = vmax.f32 %v1985_v23, %v1981_v25  ;;  %3326 = vmatprep.mubr.msk.f32.mxu1 %vm4066_vm0, %v4065_v0  ;;  %v1988_v32 = vmax.f32 %v1984_v28, %v1980_v24  ;;  %v2168_v25 = vld [vmem:[#allocation25] sm:$0xff] }
 0xa59   :  { %3337 = vmatpush3.msra.mxu0 %v1989_v29 }
 0xa5a   :  { %3327 = vmatmul.mubr.msk.f32.gmra.mxu1 %vm872_vm9, %v1869_v30  ;;  %3338 = vmatprep.subr.mxu0 %v4065_v0 }
 0xa5b   :  { %3339 = vmatpush3.msra.mxu0 %v1988_v32  ;;  %3329 = vmatprep.mubr.msk.f32.mxu1 %vm4066_vm0, %v4065_v0 }
 0xa5c   :  { %3341 = vmatmul.mubr.msk.f32.vlgmr.msra.gmra.mxu0 %vm1061_vm10, %v1992_v33  ;;  %3343 = vmatprep.subr.mxu0 %v4065_v0 }
 0xa5d   :  { %3351 = vmatprep.mubr.msk.f32.mxu0 %vm4066_vm0, %v4065_v0 }
 0xa5e   :  { %3330 = vmatmul.mubr.msk.f32.gmra.mxu1 %vm872_vm9, %v1870_v35  ;;  %v2292_v35 = vld [vmem:[#allocation27] sm:$0xff] }
 0xa5f   :  { %3372 = vmatprep.mubr.msk.f32.mxu1 %vm4066_vm0, %v4065_v0 }
 0xb16   :  { %v1946_v38 = vpop.f32.mrf.mxu1 }
 0xb17   :  { %v4645_v56 = vmax.f32 %v1946_v38, 0.0 }
 0xb18   :  { %v3325_v40 = vpop.f32.mrf.mxu1 }
 0xb1a   :  { %v1951_v47 = vpop.f32.mrf.mxu1 }
 0xb1b   :  { %v4638_v55 = vmax.f32 %v1951_v47, 0.0 }
 0xb1c   :  { %v3328_v48 = vpop.f32.mrf.mxu1  ;;  %v2062_v49 = vpop.f32.mrf.mxu0 }
 0xb1d   :  { %v2069_v50 = vmax.f32 %v2062_v49, 0.0 }
 0xb1e   :  { %v1956_v51 = vpop.f32.mrf.mxu1  ;;  %v3342_v52 = vpop.f32.mrf.mxu0 }
 0xb1f   :  { %v4634_v53 = vmax.f32 %v1956_v51, 0.0  ;;  %2278 = vrot.lane.b32.xlu1 %v2069_v50, %s4069_s29  ;;  %2266 = vrot.lane.b32.xlu0 %v2069_v50, %s4044_s11 }
 0xb20   :  { %3344 = vmatpush3.msra.mxu0 %v2069_v50  ;;  %v3331_v54 = vpop.f32.mrf.mxu1 }
 0xb21   :  { %3345 = vmatprep.subr.mxu0 %v4065_v0 }
 0xb22   :  { %3346 = vmatpush3.msra.mxu0 %v4634_v53 }
 0xb23   :  { %3347 = vmatprep.subr.mxu0 %v4065_v0  ;;  %2262 = vrot.lane.b32.xlu1 %v4638_v55, %s4044_s11 }
 0xb24   :  { %2264 = vrot.lane.b32.xlu0 %v4634_v53, %s4044_s11  ;;  %3348 = vmatpush3.msra.mxu0 %v4638_v55 }
 0xb25   :  { %3349 = vmatprep.subr.mxu0 %v4065_v0 }
 0xb26   :  { %3350 = vmatpush3.msra.mxu0 %v4645_v56 }
 0xb27   :  { %3352 = vmatmul.mubr.msk.f32.vlgmr.msra.gmra.mxu0 %vm1061_vm10, %v2070_v57  ;;  %3381 = vmatprep.subr.mxu0 %v4065_v0  ;;  %v2370_v57 = vld [vmem:[#allocation28] sm:$0xff] }
 0xb28   :  { %3389 = vmatprep.mubr.msk.f32.mxu0 %vm4066_vm0, %v4065_v0 }
 0xb91   :  { %v2279_v58 = vpop.permute.xlu1 %2278  ;;  %v2267_v59 = vpop.permute.xlu0 %2266 }
 0xb92   :  { %v2271_v60 = vadd.f32 %v4349_v42, %v2267_v59  ;;  %v2283_v61 = vadd.f32 %v4354_v46, %v2279_v58 }
 0xb94   :  { %v2287_v62 = vmax.f32 %v2271_v60, %v2069_v50  ;;  %v2697_v60 = vld [vmem:[%s4854_s5 + $0x78] sm:$0xff] }
 0xb95   :  { %v2263_v4 = vpop.permute.xlu1 %2262 }
 0xb96   :  { %v2291_v63 = vmax.f32 %v2287_v62, %v2283_v61  ;;  %v2265_v5 = vpop.permute.xlu0 %2264  ;;  %v2269_v21 = vadd.f32 %v4349_v42, %v2263_v4  ;;  %v2696_v61 = vld [vmem:[%s4854_s5 + $0x70] sm:$0xff]  ;;  %v2695_v62 = vld [vmem:[%s4854_s5 + $0x68] sm:$0xff] }
 0xb97   :  { %v2270_v11 = vadd.f32 %v4349_v42, %v2265_v5  ;;  %v2691_v4 = vld [vmem:[%s4854_s5 + $0x48] sm:$0xff]  ;;  %v2690_v5 = vld [vmem:[%s4854_s5 + $0x40] sm:$0xff] }
 0xb98   :  { %3382 = vmatpush3.msra.mxu0 %v2291_v63  ;;  %v2285_v29 = vmax.f32 %v2269_v21, %v4638_v55  ;;  %v2694_v63 = vld [vmem:[%s4854_s5 + $0x60] sm:$0xff] }
 0xb99   :  { %3383 = vmatprep.subr.mxu0 %v4065_v0 }
 0xbe7   :  { %v2140_v1 = vpop.f32.mrf.mxu0 }
 0xbe8   :  { %2162 = vrot.lane.b32.xlu1 %v2140_v1, %s4070_s22  ;;  %2165 = vrot.lane.b32.xlu0 %v2140_v1, %s4068_s12 }
 0xbe9   :  { %v3353_v2 = vpop.f32.mrf.mxu0 }
 0xbea   :  { %v2692_v2 = vld [vmem:[%s4854_s5 + $0x50] sm:$0xff] }
 0xbec   :  { %2156 = vrot.lane.b32.xlu1 %v2140_v1, %s4069_s29  ;;  %2159 = vrot.lane.b32.xlu0 %v2140_v1, %s4067_s18 }
 0xbf0   :  { %2150 = vrot.lane.b32.xlu1 %v2140_v1, %s4071_s6  ;;  %2276 = vrot.lane.b32.xlu0 %v4634_v53, %s4069_s29 }
 0xbf4   :  { %2147 = vrot.lane.b32.xlu1 %v2140_v1, %s4073_s14  ;;  %2153 = vrot.lane.b32.xlu0 %v2140_v1, %s4044_s11 }
 0xbf8   :  { %2260 = vrot.lane.b32.xlu1 %v4645_v56, %s4044_s11  ;;  %2144 = vrot.lane.b32.xlu0 %v2140_v1, %s4072_s23 }
 0xbfc   :  { %2272 = vrot.lane.b32.xlu1 %v4645_v56, %s4069_s29  ;;  %2274 = vrot.lane.b32.xlu0 %v4638_v55, %s4069_s29 }
 0xc5a   :  { %v2163_v6 = vpop.permute.xlu1 %2162  ;;  %v2166_v7 = vpop.permute.xlu0 %2165 }
 0xc5b   :  { %v2167_v8 = vmul.f32 %v4325_v22, %v2166_v7  ;;  %v2164_v3 = vmul.f32 %v4328_v26, %v2163_v6  ;;  %v2286_v26 = vmax.f32 %v2270_v11, %v4634_v53  ;;  %v2689_v6 = vld [vmem:[%s4854_s5 + $0x38] sm:$0xff]  ;;  %v2688_v7 = vld [vmem:[%s4854_s5 + $0x30] sm:$0xff] }
 0xc5d   :  { %3355 = vmatpush3.msra.mxu1 %v2167_v8  ;;  %v2687_v8 = vld [vmem:[%s4854_s5 + $0x28] sm:$0xff] }
 0xc5e   :  { %v2157_v9 = vpop.permute.xlu1 %2156  ;;  %3356 = vmatprep.subr.mxu1 %v4065_v0  ;;  %v2160_v10 = vpop.permute.xlu0 %2159 }
 0xc5f   :  { %v2161_v12 = vmul.f32 %v4330_v27, %v2160_v10  ;;  %3357 = vmatpush3.msra.mxu1 %v2164_v3  ;;  %v2158_v17 = vmul.f32 %v4334_v31, %v2157_v9 }
 0xc60   :  { %3358 = vmatprep.subr.mxu1 %v4065_v0 }
 0xc61   :  { %3359 = vmatpush3.msra.mxu1 %v2161_v12  ;;  %v3557_v12 = vld [vmem:[#allocation6 + $0x8] ss:$0 sm:$0xff] }
 0xc62   :  { %v2151_v13 = vpop.permute.xlu1 %2150  ;;  %3360 = vmatprep.subr.mxu1 %v4065_v0  ;;  %v2277_v22 = vpop.permute.xlu0 %2276 }
 0xc63   :  { %v2282_v14 = vadd.f32 %v4354_v46, %v2277_v22  ;;  %3361 = vmatpush3.msra.mxu1 %v2158_v17  ;;  %v2152_v18 = vmul.f32 %v4342_v37, %v2151_v13  ;;  %v3558_v13 = vld [vmem:[#allocation6 + $0x7] ss:$0 sm:$0xff] }
 0xc64   :  { %3362 = vmatprep.subr.mxu1 %v4065_v0 }
 0xc65   :  { %v2290_v15 = vmax.f32 %v2286_v26, %v2282_v14  ;;  %3363 = vmatpush3.msra.mxu1 %v2140_v1  ;;  %v2693_v1 = vld [vmem:[%s4854_s5 + $0x58] sm:$0xff] }
 0xc66   :  { %v2148_v27 = vpop.permute.xlu1 %2147  ;;  %v2154_v16 = vpop.permute.xlu0 %2153  ;;  %3364 = vmatprep.subr.mxu1 %v4065_v0 }
 0xc67   :  { %v2155_v31 = vmul.f32 %v4339_v36, %v2154_v16  ;;  %3384 = vmatpush3.msra.mxu0 %v2290_v15  ;;  %v2149_v23 = vmul.f32 %v4346_v41, %v2148_v27  ;;  %v3559_v15 = vld [vmem:[#allocation6 + $0x6] ss:$0 sm:$0xff]  ;;  %v3560_v16 = vld [vmem:[#allocation6 + $0x5] ss:$0 sm:$0xff] }
 0xc68   :  { %3385 = vmatprep.subr.mxu0 %v4065_v0 }
 0xc69   :  { %3365 = vmatpush3.msra.mxu1 %v2155_v31 }
 0xc6a   :  { %v2261_v19 = vpop.permute.xlu1 %2260  ;;  %3366 = vmatprep.subr.mxu1 %v4065_v0  ;;  %v2145_v20 = vpop.permute.xlu0 %2144 }
 0xc6b   :  { %3367 = vmatpush3.msra.mxu1 %v2152_v18  ;;  %v2268_v24 = vadd.f32 %v4349_v42, %v2261_v19  ;;  %v2146_v36 = vmul.f32 %v4352_v44, %v2145_v20  ;;  %v2169_v44 = vld [vmem:[#allocation25 + $0x8] sm:$0xff]  ;;  %v3561_v20 = vld [vmem:[#allocation6 + $0x3] ss:$0 sm:$0xff] }
 0xc6c   :  { %3368 = vmatprep.subr.mxu1 %v4065_v0 }
 0xc6d   :  { %3369 = vmatpush3.msra.mxu1 %v2149_v23  ;;  %v2284_v41 = vmax.f32 %v2268_v24, %v4645_v56 }
 0xc6e   :  { %v2273_v28 = vpop.permute.xlu1 %2272  ;;  %3370 = vmatprep.subr.mxu1 %v4065_v0  ;;  %v2275_v37 = vpop.permute.xlu0 %2274 }
 0xc6f   :  { %v2280_v30 = vadd.f32 %v4354_v46, %v2273_v28  ;;  %v2281_v32 = vadd.f32 %v4354_v46, %v2275_v37  ;;  %3371 = vmatpush3.msra.mxu1 %v2146_v36  ;;  %v2170_v46 = vld [vmem:[#allocation25 + $0x10] sm:$0xff]  ;;  %v3562_v36 = vld [vmem:[#allocation7] ss:$0 sm:$0xff]  ;;  %v3563_v28 = vld [vmem:[#allocation6 + $0x2] ss:$0 sm:$0xff] }
 0xc70   :  { %3373 = vmatmul.mubr.msk.f32.vlgmr.msra.gmra.mxu1 %vm872_vm9, %v2168_v25  ;;  %3403 = vmatprep.subr.mxu1 %v4065_v0 }
 0xc71   :  { %v2289_v42 = vmax.f32 %v2285_v29, %v2281_v32  ;;  %3375 = vmatprep.mubr.msk.f32.mxu1 %vm4066_vm0, %v4065_v0  ;;  %v2288_v33 = vmax.f32 %v2284_v41, %v2280_v30  ;;  %v3564_v29 = vld [vmem:[#allocation6 + $0x1] ss:$0 sm:$0xff] }
 0xc73   :  { %3386 = vmatpush3.msra.mxu0 %v2289_v42 }
 0xc74   :  { %3376 = vmatmul.mubr.msk.f32.gmra.mxu1 %vm872_vm9, %v2169_v44  ;;  %3387 = vmatprep.subr.mxu0 %v4065_v0 }
 0xc75   :  { %3388 = vmatpush3.msra.mxu0 %v2288_v33  ;;  %3378 = vmatprep.mubr.msk.f32.mxu1 %vm4066_vm0, %v4065_v0  ;;  %v3565_v33 = vld [vmem:[#allocation6] ss:$0 sm:$0xff] }
 0xc76   :  { %3390 = vmatmul.mubr.msk.f32.vlgmr.msra.gmra.mxu0 %vm1061_vm10, %v2292_v35  ;;  %3392 = vmatprep.subr.mxu0 %v4065_v0 }
 0xc77   :  { %3400 = vmatprep.mubr.msk.f32.mxu0 %vm4066_vm0, %v4065_v0 }
 0xc78   :  { %3379 = vmatmul.mubr.msk.f32.gmra.mxu1 %vm872_vm9, %v2170_v46  ;;  %v3566_v46 = vld [vmem:[#allocation7 + $0x1] ss:$0 sm:$0xff] }
 0xc79   :  { %3421 = vmatprep.mubr.msk.f32.mxu1 %vm4066_vm0, %v4065_v0 }
 0xd30   :  { %v2246_v38 = vpop.f32.mrf.mxu1 }
 0xd31   :  { %v4730_v56 = vmax.f32 %v2246_v38, 0.0 }
 0xd32   :  { %v3374_v40 = vpop.f32.mrf.mxu1 }
 0xd33   :  { %v2468_v40 = vld [vmem:[#allocation30] sm:$0xff] }
 0xd34   :  { %v2251_v47 = vpop.f32.mrf.mxu1 }
 0xd35   :  { %v4724_v55 = vmax.f32 %v2251_v47, 0.0 }
 0xd36   :  { %v3377_v48 = vpop.f32.mrf.mxu1  ;;  %v2362_v49 = vpop.f32.mrf.mxu0 }
 0xd37   :  { %v4716_v50 = vmax.f32 %v2362_v49, 0.0 }
 0xd38   :  { %v2256_v51 = vpop.f32.mrf.mxu1  ;;  %v3391_v52 = vpop.f32.mrf.mxu0 }
 0xd39   :  { %v4718_v53 = vmax.f32 %v2256_v51, 0.0  ;;  %2566 = vrot.lane.b32.xlu0 %v4716_v50, %s4044_s11  ;;  %3393 = vmatpush3.msra.mxu0 %v4716_v50 }
 0xd3a   :  { %v3380_v54 = vpop.f32.mrf.mxu1  ;;  %3394 = vmatprep.subr.mxu0 %v4065_v0 }
 0xd3b   :  { %2564 = vrot.lane.b32.xlu1 %v4718_v53, %s4044_s11  ;;  %3395 = vmatpush3.msra.mxu0 %v4718_v53  ;;  %v2469_v54 = vld [vmem:[#allocation30 + $0x8] sm:$0xff] }
 0xd3c   :  { %3396 = vmatprep.subr.mxu0 %v4065_v0 }
 0xd3d   :  { %3397 = vmatpush3.msra.mxu0 %v4724_v55 }
 0xd3e   :  { %3398 = vmatprep.subr.mxu0 %v4065_v0 }
 0xd3f   :  { %3399 = vmatpush3.msra.mxu0 %v4730_v56 }
 0xd40   :  { %3401 = vmatmul.mubr.msk.f32.vlgmr.msra.gmra.mxu0 %vm1061_vm10, %v2370_v57  ;;  %3441 = vmatprep.subr.mxu0 %v2697_v60 }
 0xd41   :  { %3442 = vmatpush3.msra.mxu0 %v2697_v60 }
 0xd42   :  { %3443 = vmatprep.subr.mxu0 %v2696_v61 }
 0xd43   :  { %3444 = vmatpush3.msra.mxu0 %v2696_v61 }
 0xd44   :  { %3445 = vmatprep.subr.mxu0 %v2695_v62 }
 0xd45   :  { %3446 = vmatpush3.msra.mxu0 %v2695_v62 }
 0xd46   :  { %3447 = vmatprep.subr.mxu0 %v2694_v63 }
 0xd47   :  { %3448 = vmatpush3.msra.mxu0 %v2694_v63 }
 0xd48   :  { %3449 = vmatprep.subr.mxu0 %v2693_v1 }
 0xd49   :  { %3450 = vmatpush3.msra.mxu0 %v2693_v1 }
 0xd4a   :  { %3451 = vmatprep.subr.mxu0 %v2692_v2 }
 0xd4b   :  { %3452 = vmatpush3.msra.mxu0 %v2692_v2 }
 0xd4c   :  { %3453 = vmatprep.subr.mxu0 %v2691_v4 }
 0xd4d   :  { %3454 = vmatpush3.msra.mxu0 %v2691_v4 }
 0xd4e   :  { %3455 = vmatprep.subr.mxu0 %v2690_v5 }
 0xd4f   :  { %3456 = vmatpush3.msra.mxu0 %v2690_v5  ;;  %v2685_v5 = vld [vmem:[%s4854_s5 + $0x18] sm:$0xff] }
 0xd50   :  { %3457 = vmatprep.subr.mxu0 %v2689_v6 }
 0xd51   :  { %3458 = vmatpush3.msra.mxu0 %v2689_v6  ;;  %v2684_v6 = vld [vmem:[%s4854_s5 + $0x10] sm:$0xff] }
 0xd52   :  { %3459 = vmatprep.subr.mxu0 %v2688_v7 }
 0xd53   :  { %3460 = vmatpush3.msra.mxu0 %v2688_v7  ;;  %v2683_v7 = vld [vmem:[%s4854_s5 + $0x8] sm:$0xff] }
 0xd54   :  { %3461 = vmatprep.subr.mxu0 %v2687_v8 }
 0xd55   :  { %3462 = vmatpush3.msra.mxu0 %v2687_v8  ;;  %v2682_v8 = vld [vmem:[%s4854_s5] sm:$0xff] }
 0xdab   :  { %v2567_v3 = vpop.permute.xlu0 %2566 }
 0xdac   :  { %v2571_v25 = vadd.f32 %v3562_v36, %v2567_v3 }
 0xdad   :  { %v2565_v9 = vpop.permute.xlu1 %2564 }
 0xdae   :  { %v2587_v42 = vmax.f32 %v2571_v25, %v4716_v50  ;;  %v2570_v44 = vadd.f32 %v3562_v36, %v2565_v9 }
 0xdb0   :  { %v2586_v51 = vmax.f32 %v2570_v44, %v4718_v53 }
 0xe00   :  { %v4736_v58 = vpop.f32.mrf.mxu0 }
 0xe01   :  { %2462 = vrot.lane.b32.xlu1 %v4736_v58, %s4070_s22  ;;  %2465 = vrot.lane.b32.xlu0 %v4736_v58, %s4068_s12 }
 0xe02   :  { %v3402_v59 = vpop.f32.mrf.mxu0 }
 0xe05   :  { %2456 = vrot.lane.b32.xlu1 %v4736_v58, %s4069_s29  ;;  %2459 = vrot.lane.b32.xlu0 %v4736_v58, %s4067_s18 }
 0xe09   :  { %2450 = vrot.lane.b32.xlu1 %v4736_v58, %s4071_s6  ;;  %2453 = vrot.lane.b32.xlu0 %v4736_v58, %s4044_s11 }
 0xe0d   :  { %2444 = vrot.lane.b32.xlu1 %v4736_v58, %s4072_s23  ;;  %2447 = vrot.lane.b32.xlu0 %v4736_v58, %s4073_s14 }
 0xe11   :  { %2562 = vrot.lane.b32.xlu1 %v4724_v55, %s4044_s11  ;;  %2578 = vrot.lane.b32.xlu0 %v4716_v50, %s4069_s29 }
 0xe15   :  { %2560 = vrot.lane.b32.xlu1 %v4730_v56, %s4044_s11  ;;  %2576 = vrot.lane.b32.xlu0 %v4718_v53, %s4069_s29  ;;  %v2470_v53 = vld [vmem:[#allocation30 + $0x10] sm:$0xff] }
 0xe19   :  { %2572 = vrot.lane.b32.xlu1 %v4730_v56, %s4069_s29  ;;  %2574 = vrot.lane.b32.xlu0 %v4724_v55, %s4069_s29 }
 0xe73   :  { %v2463_v10 = vpop.permute.xlu1 %2462  ;;  %v2466_v11 = vpop.permute.xlu0 %2465 }
 0xe74   :  { %v2467_v17 = vmul.f32 %v3557_v12, %v2466_v11  ;;  %v2464_v22 = vmul.f32 %v3558_v13, %v2463_v10  ;;  %v2670_v10 = vmul.f32 0.999995, %v4562_v45 }
 0xe76   :  { %3404 = vmatpush3.msra.mxu1 %v2467_v17 }
 0xe77   :  { %v2457_v26 = vpop.permute.xlu1 %2456  ;;  %3405 = vmatprep.subr.mxu1 %v4065_v0  ;;  %v2460_v14 = vpop.permute.xlu0 %2459 }
 0xe78   :  { %v2461_v27 = vmul.f32 %v3559_v15, %v2460_v14  ;;  %3406 = vmatpush3.msra.mxu1 %v2464_v22  ;;  %v2458_v31 = vmul.f32 %v3560_v16, %v2457_v26  ;;  %v2671_v26 = vmul.f32 0.999995, %v4555_v43 }
 0xe79   :  { %3407 = vmatprep.subr.mxu1 %v4065_v0 }
 0xe7a   :  { %3408 = vmatpush3.msra.mxu1 %v2461_v27 }
 0xe7b   :  { %v2451_v18 = vpop.permute.xlu1 %2450  ;;  %3409 = vmatprep.subr.mxu1 %v4065_v0  ;;  %v2454_v19 = vpop.permute.xlu0 %2453 }
 0xe7c   :  { %3410 = vmatpush3.msra.mxu1 %v2458_v31  ;;  %v2455_v21 = vmul.f32 %v3561_v20, %v2454_v19  ;;  %v2452_v37 = vmul.f32 %v3563_v28, %v2451_v18  ;;  %v2672_v18 = vmul.f32 0.999995, %v4548_v39  ;;  %v2784_v28 = vld [vmem:[%s4233_s25] sm:$0xf] }
 0xe7d   :  { %3411 = vmatprep.subr.mxu1 %v4065_v0 }
 0xe7e   :  { %3412 = vmatpush3.msra.mxu1 %v4736_v58 }
 0xe7f   :  { %v2445_v23 = vpop.permute.xlu1 %2444  ;;  %3413 = vmatprep.subr.mxu1 %v4065_v0  ;;  %v2448_v24 = vpop.permute.xlu0 %2447 }
 0xe80   :  { %3414 = vmatpush3.msra.mxu1 %v2455_v21  ;;  %v2449_v30 = vmul.f32 %v3564_v29, %v2448_v24  ;;  %v2446_v35 = vmul.f32 %v3565_v33, %v2445_v23  ;;  %v2673_v24 = vmul.f32 0.999995, %v4546_v34  ;;  %v2783_v34 = vld [vmem:[#allocation33] sm:$0xf] }
 0xe81   :  { %3415 = vmatprep.subr.mxu1 %v4065_v0 }
 0xe82   :  { %3416 = vmatpush3.msra.mxu1 %v2452_v37  ;;  %v4074_v37 = vmov 0  }
 0xe83   :  { %v2563_v32 = vpop.permute.xlu1 %2562  ;;  %3417 = vmatprep.subr.mxu1 %v4065_v0  ;;  %v2579_v41 = vpop.permute.xlu0 %2578  ;;  %3556 = vset.pattern.permute.xlu0 %v4074_v37 }
 0xe84   :  { %v2583_v38 = vadd.f32 %v3566_v46, %v2579_v41  ;;  %3418 = vmatpush3.msra.mxu1 %v2449_v30  ;;  %v2569_v50 = vadd.f32 %v3562_v36, %v2563_v32  ;;  %2787 = vperm.xlu0 %3556, %v2784_v28  }
 0xe85   :  { %3419 = vmatprep.subr.mxu1 %v4065_v0 }
 0xe86   :  { %v2591_v47 = vmax.f32 %v2587_v42, %v2583_v38  ;;  %3420 = vmatpush3.msra.mxu1 %v2446_v35  ;;  %v2585_v61 = vmax.f32 %v2569_v50, %v4724_v55  ;;  %v2592_v55 = vld [vmem:[#allocation31] sm:$0xff] }
 0xe87   :  { %v2561_v48 = vpop.permute.xlu1 %2560  ;;  %3422 = vmatmul.mubr.msk.f32.vlgmr.msra.gmra.mxu1 %vm872_vm9, %v2468_v40  ;;  %3430 = vmatprep.subr.mxu1 %v4065_v0  ;;  %v2577_v49 = vpop.permute.xlu0 %2576 }
 0xe88   :  { %v2582_v52 = vadd.f32 %v3566_v46, %v2577_v49  ;;  %3431 = vmatpush3.msra.mxu1 %v2591_v47  ;;  %3424 = vmatprep.mubr.msk.f32.mxu1 %vm4066_vm0, %v4065_v0  ;;  %v2568_v57 = vadd.f32 %v3562_v36, %v2561_v48 }
 0xe89   :  { %3432 = vmatprep.subr.mxu1 %v4065_v0 }
 0xe8a   :  { %v2590_v58 = vmax.f32 %v2586_v51, %v2582_v52  ;;  %v2584_v1 = vmax.f32 %v2568_v57, %v4730_v56  ;;  %v2686_v56 = vld [vmem:[%s4854_s5 + $0x20] sm:$0xff] }
 0xe8b   :  { %v2573_v59 = vpop.permute.xlu1 %2572  ;;  %3425 = vmatmul.mubr.msk.f32.gmra.mxu1 %vm872_vm9, %v2469_v54  ;;  %v2575_v60 = vpop.permute.xlu0 %2574  ;;  %3463 = vmatprep.subr.mxu0 %v2686_v56 }
 0xe8c   :  { %v2580_v62 = vadd.f32 %v3566_v46, %v2573_v59  ;;  %v2581_v63 = vadd.f32 %v3566_v46, %v2575_v60  ;;  %3433 = vmatpush3.msra.mxu1 %v2590_v58  ;;  %3427 = vmatprep.mubr.msk.f32.mxu1 %vm4066_vm0, %v4065_v0 }
 0xe8d   :  { %3434 = vmatprep.subr.mxu1 %v4065_v0  ;;  %3464 = vmatpush3.msra.mxu0 %v2686_v56 }
 0xe8e   :  { %v2589_v2 = vmax.f32 %v2585_v61, %v2581_v63  ;;  %v2588_v4 = vmax.f32 %v2584_v1, %v2580_v62  ;;  %3465 = vmatprep.subr.mxu0 %v2685_v5 }
 0xe8f   :  { %3428 = vmatmul.mubr.msk.f32.gmra.mxu1 %vm872_vm9, %v2470_v53  ;;  %3466 = vmatpush3.msra.mxu0 %v2685_v5 }
 0xe90   :  { %3435 = vmatpush3.msra.mxu1 %v2589_v2  ;;  %3438 = vmatprep.mubr.msk.f32.mxu1 %vm4066_vm0, %v4065_v0 }
 0xe91   :  { %3436 = vmatprep.subr.mxu1 %v4065_v0  ;;  %3467 = vmatprep.subr.mxu0 %v2684_v6 }
 0xe92   :  { %3437 = vmatpush3.msra.mxu1 %v2588_v4  ;;  %3468 = vmatpush3.msra.mxu0 %v2684_v6 }
 0xe93   :  { %3439 = vmatmul.mubr.msk.f32.vlgmr.msra.gmra.mxu1 %vm1061_vm10, %v2592_v55  ;;  %3479 = vmatprep.subr.mxu1 %v4065_v0 }
 0xe94   :  { %3487 = vmatprep.mubr.msk.f32.mxu1 %vm4066_vm0, %v4065_v0  ;;  %3469 = vmatprep.subr.mxu0 %v2683_v7 }
 0xe95   :  { %3470 = vmatpush3.msra.mxu0 %v2683_v7 }
 0xe96   :  { %3471 = vmatprep.subr.mxu0 %v2682_v8 }
 0xe97   :  { %3472 = vmatpush3.msra.mxu0 %v2682_v8 }
 0xeff   :  { %v2788_v41 = vpop.permute.xlu0 %2787 }
 0xf47   :  { %v2546_v3 = vpop.f32.mrf.mxu1 }
 0xf48   :  { %v2666_v9 = vmax.f32 %v2546_v3, 0.0 }
 0xf49   :  { %v3423_v11 = vpop.f32.mrf.mxu1 }
 0xf4a   :  { %v2674_v12 = vadd.f32 %v2670_v10, %v2666_v9 }
 0xf4b   :  { %v2551_v17 = vpop.f32.mrf.mxu1 }
 0xf4c   :  { %v2678_v13 = vmax.f32 %v2674_v12, 0.0  ;;  %v2667_v22 = vmax.f32 %v2551_v17, 0.0 }
 0xf4d   :  { %v3426_v14 = vpop.f32.mrf.mxu1 }
 0xf4e   :  { %v2675_v15 = vadd.f32 %v2671_v26, %v2667_v22  ;;  %3473 = vmatprep.mubr.f32.mxu0 %v2678_v13 }
 0xf4f   :  { %v2556_v27 = vpop.f32.mrf.mxu1 }
 0xf50   :  { %v2679_v16 = vmax.f32 %v2675_v15, 0.0  ;;  %v2668_v31 = vmax.f32 %v2556_v27, 0.0 }
 0xf51   :  { %v3429_v19 = vpop.f32.mrf.mxu1 }
 0xf52   :  { %v2676_v20 = vadd.f32 %v2672_v18, %v2668_v31  ;;  %3474 = vmatmul.mubr.f32.vlgmr.msra.gmra.mxu0 %v2679_v16 }
 0xf53   :  { %v2662_v45 = vpop.f32.mrf.mxu1 }
 0xf54   :  { %v2680_v21 = vmax.f32 %v2676_v20, 0.0  ;;  %v2669_v23 = vmax.f32 %v2662_v45, 0.0 }
 0xf55   :  { %v3440_v36 = vpop.f32.mrf.mxu1 }
 0xf56   :  { %v2677_v25 = vadd.f32 %v2673_v24, %v2669_v23  ;;  %3476 = vmatprep.mubr.f32.mxu0 %v2680_v21 }
 0xf58   :  { %v2681_v43 = vmax.f32 %v2677_v25, 0.0 }
 0xf5a   :  { %3477 = vmatmul.mubr.f32.gmra.mxu0 %v2681_v43 }
0x1012   :  { %v3475_v29 = vpop.f32.mrf.mxu0 }
0x1014   :  { %v2764_v30 = vpop.f32.mrf.mxu0 }
0x101a   :  { %v3478_v39 = vpop.f32.mrf.mxu0 }
0x101b   :  { %3480 = vmatpush3.msra.mxu1 %v3478_v39 }
0x101c   :  { %v2774_v32 = vpop.f32.mrf.mxu0  ;;  %3481 = vmatprep.subr.mxu1 %v4065_v0 }
0x101d   :  { %3482 = vmatpush3.msra.mxu1 %v2774_v32 }
0x101e   :  { %3483 = vmatprep.subr.mxu1 %v4065_v0 }
0x101f   :  { %3484 = vmatpush3.msra.mxu1 %v3475_v29 }
0x1020   :  { %3485 = vmatprep.subr.mxu1 %v4065_v0 }
0x1021   :  { %3486 = vmatpush3.msra.mxu1 %v2764_v30 }
0x1022   :  { %3488 = vmatmul.mubr.msk.f32.vlgmr.msra.gmra.mxu1 %vm1061_vm10, %v2783_v34 }
0x10e2   :  { %v2859_v42 = vpop.f32.mrf.mxu1 }
0x10e3   :  { %v2860_v44 = vadd.f32 %v2859_v42, %v2788_v41 }
0x10e4   :  { %v3489_v33 = vpop.f32.mrf.mxu1 }
0x10e5   :  { %2864 = vst.msk [vmem:[%s4238_s27] sm:$0xf] %vm2863_vm11, %v2860_v44 }
0x10e6   :  { %2869 = vsyncpa [#allocation3], 1 }
0x10e7   :  { %2870 = vsyncpa [#allocation5], 1 }
0x10e8   :  { %2871 = vsyncpa [#allocation8], 1 }
0x10e9   :  { %2872 = vsyncpa [#allocation11], 1 }
0x10ea   :  { %2873 = vsyncpa [#allocation14], 1 }
0x10eb   :  { %2874 = vsyncpa [#allocation17], 1 }
0x10ec   :  { %2875 = vsyncpa [#allocation20], 1 }
0x10ed   :  { %2876 = vsyncpa [#allocation23], 1 }
0x10ee   :  { %2877 = vsyncpa [#allocation26], 1 }
0x10ef   :  { %2878 = vsyncpa [#allocation29], 1 }
0x10f0   :  { %2879 = vsyncpa [#allocation32], 1 }

</bundles_post_ra>
